<compile_context>
chip_gen: v7x
topology: tpu7x:2x2x1
jax: 0.10.0
libtpu: 0.0.40
codegen_flags: <defaults>
</compile_context>

<pallas_src>
import functools

import jax
import jax.numpy as jnp
from jax import lax
from jax.experimental import pallas as pl
from jax.experimental.pallas import tpu as pltpu


_MAX_EXACT_TOPK = 8     # masked row-max rounds up to this k; bisection beyond
_BISECT_ITERS = 26      # f32 value-bisection iterations for the k-th |z|


def _round_up(n, m):
    return ((n + m - 1) // m) * m


def _orthogonal(key, rows, cols):
    """Deterministic orthogonal init (same spirit as nn.init.orthogonal_)."""
    n = max(rows, cols)
    a = jax.random.normal(key, (n, n), dtype=jnp.float32)
    q, r = jnp.linalg.qr(a)
    q = q * jnp.sign(jnp.diagonal(r))[None, :]
    return q[:rows, :cols]


def sae_kernel(x_ref, we_t_ref, wd_t_ref, recon_ref, acts_ref, *,
               topk, latent_dim):
    """One batch tile: encode (MXU) -> signed top-k mask (f32) -> decode (MXU)."""
    z = jnp.dot(x_ref[...], we_t_ref[...],
                preferred_element_type=jnp.float32)               # (TB, Lp) f32
    lp = z.shape[-1]

    if topk >= latent_dim:
        a = z
    else:
        absz = jnp.abs(z)
        if lp > latent_dim:
            # Padded latent columns must never win the top-k.  (1, Lp) mask,
            # broadcast over rows (lane-resolution only — cheap).
            col = lax.broadcasted_iota(jnp.int32, (1, lp), dimension=1)
            absz = jnp.where(col < latent_dim, absz, -jnp.inf)

        if topk <= _MAX_EXACT_TOPK:
            # k unrolled rounds of masked row-max -> exact k-th largest |z|.
            # Only the (TB, 1) threshold is carried across rounds; the full
            # tile is never rewritten (v5e has only one vst slot).
            def round_body(_, prev):
                below = jnp.where(absz < prev, absz, -jnp.inf)
                return jnp.max(below, axis=-1, keepdims=True)

            thresh = lax.fori_loop(
                0, topk, round_body,
                jnp.full((z.shape[0], 1), jnp.inf, jnp.float32),
                unroll=True)
        else:
            # Count-based bisection: cost independent of k (one full-tile
            # compare + one XLU row-reduce per iteration).
            def bisect_body(_, carry):
                lo, hi = carry
                mid = 0.5 * (lo + hi)
                cnt = jnp.sum((absz >= mid).astype(jnp.float32),
                              axis=-1, keepdims=True)
                ge_k = cnt >= topk
                return jnp.where(ge_k, mid, lo), jnp.where(ge_k, hi, mid)

            lo0 = jnp.zeros((z.shape[0], 1), jnp.float32)
            hi0 = jnp.max(absz, axis=-1, keepdims=True)
            lo, _ = lax.fori_loop(0, _BISECT_ITERS, bisect_body, (lo0, hi0))
            # TODO(synk): bisection keeps >= topk entries (exact up to the
            # f32 bisection resolution); if strictly-exact k is required for
            # large k, fall back to the masked row-max path.
            thresh = lo

        # TODO(synk): entries tied exactly at the k-th |value| are all kept,
        # whereas torch.topk keeps exactly k via index tie-break; identical
        # for continuous-valued inputs.
        a = jnp.where(absz >= thresh, z, 0.0)

    acts_ref[...] = a.astype(acts_ref.dtype)
    recon_ref[...] = jnp.dot(a.astype(wd_t_ref.dtype), wd_t_ref[...],
                             preferred_element_type=jnp.float32
                             ).astype(recon_ref.dtype)


def prepare_sae_params(we, wd, *, lane_multiple=256):
    """One-time weight prep: transpose, pad lane dims, cast to bf16.

    we: (L, D) encoder weight  (nn.Linear(input_dim, latent_dim).weight)
    wd: (D, L) decoder weight  (nn.Linear(latent_dim, input_dim).weight)
    lane_multiple: 256 = full-width MXU passes on v6e/v7x; use 128 on v5e if
      the extra zero-padding matters.
    Returns we_t (Dp, Lp) bf16 and wd_t (Lp, Dp) bf16.
    """
    L, D = we.shape
    Dp = _round_up(D, lane_multiple)
    Lp = _round_up(L, lane_multiple)
    we_t = jnp.zeros((Dp, Lp), jnp.bfloat16).at[:D, :L].set(
        we.T.astype(jnp.bfloat16))
    wd_t = jnp.zeros((Lp, Dp), jnp.bfloat16).at[:L, :D].set(
        wd.T.astype(jnp.bfloat16))
    return we_t, wd_t


def sae_forward(x, we_t, wd_t, topk, latent_dim, *,
                block_b=512, acts_dtype=jnp.float32):
    """x: (B, D) f32 (or pre-padded bf16). we_t: (Dp, Lp) bf16. wd_t: (Lp, Dp) bf16.
    Returns (recon (B, D) f32, acts (B, L) acts_dtype), matching the PyTorch
    module up to bf16 matmul precision."""
    B, D = x.shape
    Dp, Lp = we_t.shape
    L = latent_dim

    TB = min(block_b, _round_up(B, 8))
    # Keep at least 2 grid steps when the batch allows it, so the "parallel"
    # batch axis actually feeds both TensorCores on v7x.
    if _round_up(B, TB) // TB < 2 and B > 8:
        TB = min(TB, _round_up(-(-B // 2), 8))
    Bp = _round_up(B, TB)

    # Skip the extra pad/cast memory pass when x is already aligned bf16.
    if (Bp, Dp) == (B, D) and x.dtype == jnp.bfloat16:
        xp = x
    else:
        xp = jnp.zeros((Bp, Dp), jnp.bfloat16).at[:B, :D].set(
            x.astype(jnp.bfloat16))

    # Explicit VMEM budget (default scoped limit is only 16/32 MiB).
    acts_isz = jnp.dtype(acts_dtype).itemsize
    vmem_need = (
        2 * Dp * Lp * 2            # encoder + decoder weights (bf16, resident)
        + 2 * TB * Dp * 2          # x block, double-buffered bf16
        + 2 * TB * Dp * 4          # recon block, double-buffered f32
        + 2 * TB * Lp * acts_isz   # acts block, double-buffered
        + 4 * TB * Lp * 4          # z / |z| / select temporaries (f32)
    )
    vmem_limit = int(min(max(int(vmem_need * 1.25), 32 * 1024 * 1024),
                         128 * 1024 * 1024))

    kernel = functools.partial(sae_kernel, topk=topk, latent_dim=L)
    out_shape = (jax.ShapeDtypeStruct((Bp, Dp), jnp.float32),
                 jax.ShapeDtypeStruct((Bp, Lp), acts_dtype))
    out_specs = (pl.BlockSpec((TB, Dp), lambda i: (i, 0)),
                 pl.BlockSpec((TB, Lp), lambda i: (i, 0)))
    compiler_params = pltpu.CompilerParams(
        dimension_semantics=("parallel",),
        vmem_limit_bytes=vmem_limit)

    def build(single_buffer_weights):
        w_extra = ({"pipeline_mode": pl.Buffered(1)}
                   if single_buffer_weights else {})
        in_specs = [
            pl.BlockSpec((TB, Dp), lambda i: (i, 0)),
            # Constant block index: weights stay resident in VMEM across steps.
            pl.BlockSpec((Dp, Lp), lambda i: (0, 0), **w_extra),
            pl.BlockSpec((Lp, Dp), lambda i: (0, 0), **w_extra),
        ]
        return pl.pallas_call(
            kernel,
            out_shape=out_shape,
            grid=(Bp // TB,),
            in_specs=in_specs,
            out_specs=out_specs,
            compiler_params=compiler_params,
        )

    try:
        # Single-buffer the constant-index weight operands: saves one full
        # VMEM copy of each weight (critical on v7x's 64 MiB per TensorCore).
        recon, acts = build(True)(xp, we_t, wd_t)
    except Exception:
        # Fallback for Pallas builds that reject Buffered(1) for inputs.
        recon, acts = build(False)(xp, we_t, wd_t)

    # TODO(synk): for production SAE widths (L in the tens of thousands) add a
    # latent grid axis with a streaming top-k threshold pass + recon
    # accumulator instead of holding both full weight matrices resident
    # (required on v7x, which has only 64 MiB VMEM per TensorCore), and
    # optionally quantize weights (fp8 on v7x, int8 on v6e).
    return recon[:B, :D], acts[:B, :L]


def sae_forward_ref(x, we, wd, topk):
    """Pure-JAX reference mirroring the PyTorch forward with the same
    bf16-matmul / f32-top-k numerics as the kernel."""
    z = jnp.dot(x.astype(jnp.bfloat16), we.T.astype(jnp.bfloat16),
                preferred_element_type=jnp.float32)
    if topk < z.shape[-1]:
        absz = jnp.abs(z)
        kth = jnp.sort(absz, axis=-1)[:, -topk][:, None]
        z = jnp.where(absz >= kth, z, 0.0)
    recon = jnp.dot(z.astype(jnp.bfloat16), wd.T.astype(jnp.bfloat16),
                    preferred_element_type=jnp.float32)
    return recon, z


if __name__ == "__main__":
    batch, input_dim, latent_dim, topk = 16, 32, 64, 4

    key = jax.random.PRNGKey(0)
    k_x, k_e, k_d = jax.random.split(key, 3)

    x = jax.random.normal(k_x, (batch, input_dim), dtype=jnp.float32)
    # nn.Linear(input_dim, latent_dim).weight has shape (latent_dim, input_dim)
    we = _orthogonal(k_e, latent_dim, input_dim)
    # nn.Linear(latent_dim, input_dim).weight has shape (input_dim, latent_dim)
    wd = _orthogonal(k_d, input_dim, latent_dim)

    # One-time weight preparation (kept out of the per-call forward path).
    we_t, wd_t = prepare_sae_params(we, wd)

    # Default block_b: TB auto-shrinks to 8 here so the small demo batch still
    # exercises a multi-step (megacore-friendly) grid.
    recon, acts = sae_forward(x, we_t, wd_t, topk, latent_dim)
    jax.block_until_ready((recon, acts))

    recon_ref, acts_ref = sae_forward_ref(x, we, wd, topk)
    assert recon.shape == (batch, input_dim) and acts.shape == (batch, latent_dim)
    assert jnp.allclose(acts, acts_ref, atol=1e-3, rtol=1e-3), (
        float(jnp.max(jnp.abs(acts - acts_ref))))
    assert jnp.allclose(recon, recon_ref, atol=1e-3, rtol=1e-3), (
        float(jnp.max(jnp.abs(recon - recon_ref))))
    # Each row should have exactly `topk` nonzero activations (no ties here).
    nnz = jnp.sum(acts != 0, axis=-1)
    assert int(jnp.min(nnz)) == topk and int(jnp.max(nnz)) == topk

    print("KERNEL_OK")
</pallas_src>

<mosaic_0001>
module attributes {stable_mosaic.version = 11 : i64} {
  func.func @sae_kernel(%arg0: i32, %arg1: memref<8x256xbf16, #tpu.memory_space<vmem>>, %arg2: memref<256x256xbf16, #tpu.memory_space<vmem>>, %arg3: memref<256x256xbf16, #tpu.memory_space<vmem>>, %arg4: memref<8x256xf32, #tpu.memory_space<vmem>>, %arg5: memref<8x256xf32, #tpu.memory_space<vmem>>) attributes {dimension_semantics = [#tpu.dimension_semantics<parallel>], iteration_bounds = array<i64: 2>, scalar_prefetch = 0 : i64, scratch_operands = 0 : i64, tpu.core_type = #tpu.core_type<tc>, window_params = [{transform_indices = @transform_0, window_bounds = array<i64: 8, 256>}, {pipeline_mode = #tpu.pipeline_mode<synchronous>, transform_indices = @transform_1, window_bounds = array<i64: 256, 256>}, {pipeline_mode = #tpu.pipeline_mode<synchronous>, transform_indices = @transform_2, window_bounds = array<i64: 256, 256>}, {transform_indices = @transform_3, window_bounds = array<i64: 8, 256>}, {transform_indices = @transform_4, window_bounds = array<i64: 8, 256>}]} {
    %c0 = arith.constant 0 : index
    %c0_0 = arith.constant 0 : index
    %0 = vector.load %arg1[%c0, %c0_0] : memref<8x256xbf16, #tpu.memory_space<vmem>>, vector<8x256xbf16>
    %c0_1 = arith.constant 0 : index
    %c0_2 = arith.constant 0 : index
    %1 = vector.load %arg2[%c0_1, %c0_2] : memref<256x256xbf16, #tpu.memory_space<vmem>>, vector<256x256xbf16>
    %cst = arith.constant dense<0.000000e+00> : vector<8x256xf32>
    %2 = tpu.matmul %0, %1, %cst {dimension_numbers = #tpu.dot_dimension_numbers<[1], [0], [0], [1], [0, 0, 1, 1], [], []>} : vector<8x256xbf16>, vector<256x256xbf16>, vector<8x256xf32> -> vector<8x256xf32>
    %3 = math.absf %2 : vector<8x256xf32>
    %4 = tpu.iota {dimensions = array<i32: 1>} : vector<1x256xi32>
    %c64_i32 = arith.constant 64 : i32
    %5 = vector.broadcast %c64_i32 : i32 to vector<1x256xi32>
    %6 = arith.cmpi slt, %4, %5 : vector<1x256xi32>
    %cst_3 = arith.constant 0xFF800000 : f32
    %7 = vector.shape_cast %6 : vector<1x256xi1> to vector<1x256xi1>
    %8 = vector.broadcast %7 : vector<1x256xi1> to vector<8x256xi1>
    %9 = vector.broadcast %cst_3 : f32 to vector<8x256xf32>
    %10 = arith.select %8, %3, %9 : vector<8x256xi1>, vector<8x256xf32>
    %cst_4 = arith.constant 0x7F800000 : f32
    %11 = vector.broadcast %cst_4 : f32 to vector<8x1xf32>
    %c0_i32 = arith.constant 0 : i32
    %12 = vector.broadcast %11 : vector<8x1xf32> to vector<8x256xf32>
    %13 = arith.cmpf olt, %10, %12 : vector<8x256xf32>
    %cst_5 = arith.constant 0xFF800000 : f32
    %14 = vector.broadcast %cst_5 : f32 to vector<8x256xf32>
    %15 = arith.select %13, %10, %14 : vector<8x256xi1>, vector<8x256xf32>
    %cst_6 = arith.constant dense<0xFF800000> : vector<8xf32>
    %16 = vector.multi_reduction <maximumf>, %15, %cst_6 [1] : vector<8x256xf32> to vector<8xf32>
    %17 = vector.shape_cast %16 : vector<8xf32> to vector<8x1xf32>
    %c1_i32 = arith.constant 1 : i32
    %18 = vector.broadcast %17 : vector<8x1xf32> to vector<8x256xf32>
    %19 = arith.cmpf olt, %10, %18 : vector<8x256xf32>
    %cst_7 = arith.constant 0xFF800000 : f32
    %20 = vector.broadcast %cst_7 : f32 to vector<8x256xf32>
    %21 = arith.select %19, %10, %20 : vector<8x256xi1>, vector<8x256xf32>
    %cst_8 = arith.constant dense<0xFF800000> : vector<8xf32>
    %22 = vector.multi_reduction <maximumf>, %21, %cst_8 [1] : vector<8x256xf32> to vector<8xf32>
    %23 = vector.shape_cast %22 : vector<8xf32> to vector<8x1xf32>
    %c2_i32 = arith.constant 2 : i32
    %24 = vector.broadcast %23 : vector<8x1xf32> to vector<8x256xf32>
    %25 = arith.cmpf olt, %10, %24 : vector<8x256xf32>
    %cst_9 = arith.constant 0xFF800000 : f32
    %26 = vector.broadcast %cst_9 : f32 to vector<8x256xf32>
    %27 = arith.select %25, %10, %26 : vector<8x256xi1>, vector<8x256xf32>
    %cst_10 = arith.constant dense<0xFF800000> : vector<8xf32>
    %28 = vector.multi_reduction <maximumf>, %27, %cst_10 [1] : vector<8x256xf32> to vector<8xf32>
    %29 = vector.shape_cast %28 : vector<8xf32> to vector<8x1xf32>
    %c3_i32 = arith.constant 3 : i32
    %30 = vector.broadcast %29 : vector<8x1xf32> to vector<8x256xf32>
    %31 = arith.cmpf olt, %10, %30 : vector<8x256xf32>
    %cst_11 = arith.constant 0xFF800000 : f32
    %32 = vector.broadcast %cst_11 : f32 to vector<8x256xf32>
    %33 = arith.select %31, %10, %32 : vector<8x256xi1>, vector<8x256xf32>
    %cst_12 = arith.constant dense<0xFF800000> : vector<8xf32>
    %34 = vector.multi_reduction <maximumf>, %33, %cst_12 [1] : vector<8x256xf32> to vector<8xf32>
    %35 = vector.shape_cast %34 : vector<8xf32> to vector<8x1xf32>
    %36 = vector.broadcast %35 : vector<8x1xf32> to vector<8x256xf32>
    %37 = arith.cmpf oge, %10, %36 : vector<8x256xf32>
    %cst_13 = arith.constant 0.000000e+00 : f32
    %38 = vector.broadcast %cst_13 : f32 to vector<8x256xf32>
    %39 = arith.select %37, %2, %38 : vector<8x256xi1>, vector<8x256xf32>
    %c0_14 = arith.constant 0 : index
    %c0_15 = arith.constant 0 : index
    %40 = vector.load %arg5[%c0_14, %c0_15] : memref<8x256xf32, #tpu.memory_space<vmem>>, vector<8x256xf32>
    tpu.vector_store %arg5[%c0_14, %c0_15], %39 {strides = array<i32>} : memref<8x256xf32, #tpu.memory_space<vmem>>, vector<8x256xf32>,
    %41 = arith.truncf %39 : vector<8x256xf32> to vector<8x256xbf16>
    %c0_16 = arith.constant 0 : index
    %c0_17 = arith.constant 0 : index
    %42 = vector.load %arg3[%c0_16, %c0_17] : memref<256x256xbf16, #tpu.memory_space<vmem>>, vector<256x256xbf16>
    %cst_18 = arith.constant dense<0.000000e+00> : vector<8x256xf32>
    %43 = tpu.matmul %41, %42, %cst_18 {dimension_numbers = #tpu.dot_dimension_numbers<[1], [0], [0], [1], [0, 0, 1, 1], [], []>} : vector<8x256xbf16>, vector<256x256xbf16>, vector<8x256xf32> -> vector<8x256xf32>
    %c0_19 = arith.constant 0 : index
    %c0_20 = arith.constant 0 : index
    %44 = vector.load %arg4[%c0_19, %c0_20] : memref<8x256xf32, #tpu.memory_space<vmem>>, vector<8x256xf32>
    tpu.vector_store %arg4[%c0_19, %c0_20], %43 {strides = array<i32>} : memref<8x256xf32, #tpu.memory_space<vmem>>, vector<8x256xf32>,
    return
  }
  func.func @transform_0(%arg0: i32) -> (i32, i32) {
    %c0_i32 = arith.constant 0 : i32
    %c0_i32_0 = arith.constant 0 : i32
    return %arg0, %c0_i32 : i32, i32
  }
  func.func @transform_1(%arg0: i32) -> (i32, i32) {
    %c0_i32 = arith.constant 0 : i32
    %c0_i32_0 = arith.constant 0 : i32
    %c0_i32_1 = arith.constant 0 : i32
    return %c0_i32, %c0_i32_0 : i32, i32
  }
  func.func @transform_2(%arg0: i32) -> (i32, i32) {
    %c0_i32 = arith.constant 0 : i32
    %c0_i32_0 = arith.constant 0 : i32
    %c0_i32_1 = arith.constant 0 : i32
    return %c0_i32, %c0_i32_0 : i32, i32
  }
  func.func @transform_3(%arg0: i32) -> (i32, i32) {
    %c0_i32 = arith.constant 0 : i32
    %c0_i32_0 = arith.constant 0 : i32
    return %arg0, %c0_i32 : i32, i32
  }
  func.func @transform_4(%arg0: i32) -> (i32, i32) {
    %c0_i32 = arith.constant 0 : i32
    %c0_i32_0 = arith.constant 0 : i32
    return %arg0, %c0_i32 : i32, i32
  }
}

module attributes {stable_mosaic.version = 11 : i64} {
  func.func @sae_kernel(%arg0: i32, %arg1: memref<8x256xbf16, #tpu.memory_space<vmem>>, %arg2: memref<256x256xbf16, #tpu.memory_space<vmem>>, %arg3: memref<256x256xbf16, #tpu.memory_space<vmem>>, %arg4: memref<8x256xf32, #tpu.memory_space<vmem>>, %arg5: memref<8x256xf32, #tpu.memory_space<vmem>>) attributes {dimension_semantics = [#tpu.dimension_semantics<parallel>], iteration_bounds = array<i64: 2>, scalar_prefetch = 0 : i64, scratch_operands = 0 : i64, tpu.core_type = #tpu.core_type<tc>, window_params = [{transform_indices = @transform_0, window_bounds = array<i64: 8, 256>}, {pipeline_mode = #tpu.pipeline_mode<synchronous>, transform_indices = @transform_1, window_bounds = array<i64: 256, 256>}, {pipeline_mode = #tpu.pipeline_mode<synchronous>, transform_indices = @transform_2, window_bounds = array<i64: 256, 256>}, {transform_indices = @transform_3, window_bounds = array<i64: 8, 256>}, {transform_indices = @transform_4, window_bounds = array<i64: 8, 256>}]} {
    %c0 = arith.constant 0 : index
    %c0_0 = arith.constant 0 : index
    %0 = vector.load %arg1[%c0, %c0_0] : memref<8x256xbf16, #tpu.memory_space<vmem>>, vector<8x256xbf16>
    %c0_1 = arith.constant 0 : index
    %c0_2 = arith.constant 0 : index
    %1 = vector.load %arg2[%c0_1, %c0_2] : memref<256x256xbf16, #tpu.memory_space<vmem>>, vector<256x256xbf16>
    %cst = arith.constant dense<0.000000e+00> : vector<8x256xf32>
    %2 = tpu.matmul %0, %1, %cst {dimension_numbers = #tpu.dot_dimension_numbers<[1], [0], [0], [1], [0, 0, 1, 1], [], []>} : vector<8x256xbf16>, vector<256x256xbf16>, vector<8x256xf32> -> vector<8x256xf32>
    %3 = math.absf %2 : vector<8x256xf32>
    %4 = tpu.iota {dimensions = array<i32: 1>} : vector<1x256xi32>
    %c64_i32 = arith.constant 64 : i32
    %5 = vector.broadcast %c64_i32 : i32 to vector<1x256xi32>
    %6 = arith.cmpi slt, %4, %5 : vector<1x256xi32>
    %cst_3 = arith.constant 0xFF800000 : f32
    %7 = vector.shape_cast %6 : vector<1x256xi1> to vector<1x256xi1>
    %8 = vector.broadcast %7 : vector<1x256xi1> to vector<8x256xi1>
    %9 = vector.broadcast %cst_3 : f32 to vector<8x256xf32>
    %10 = arith.select %8, %3, %9 : vector<8x256xi1>, vector<8x256xf32>
    %cst_4 = arith.constant 0x7F800000 : f32
    %11 = vector.broadcast %cst_4 : f32 to vector<8x1xf32>
    %c0_i32 = arith.constant 0 : i32
    %12 = vector.broadcast %11 : vector<8x1xf32> to vector<8x256xf32>
    %13 = arith.cmpf olt, %10, %12 : vector<8x256xf32>
    %cst_5 = arith.constant 0xFF800000 : f32
    %14 = vector.broadcast %cst_5 : f32 to vector<8x256xf32>
    %15 = arith.select %13, %10, %14 : vector<8x256xi1>, vector<8x256xf32>
    %cst_6 = arith.constant dense<0xFF800000> : vector<8xf32>
    %16 = vector.multi_reduction <maximumf>, %15, %cst_6 [1] : vector<8x256xf32> to vector<8xf32>
    %17 = vector.shape_cast %16 : vector<8xf32> to vector<8x1xf32>
    %c1_i32 = arith.constant 1 : i32
    %18 = vector.broadcast %17 : vector<8x1xf32> to vector<8x256xf32>
    %19 = arith.cmpf olt, %10, %18 : vector<8x256xf32>
    %cst_7 = arith.constant 0xFF800000 : f32
    %20 = vector.broadcast %cst_7 : f32 to vector<8x256xf32>
    %21 = arith.select %19, %10, %20 : vector<8x256xi1>, vector<8x256xf32>
    %cst_8 = arith.constant dense<0xFF800000> : vector<8xf32>
    %22 = vector.multi_reduction <maximumf>, %21, %cst_8 [1] : vector<8x256xf32> to vector<8xf32>
    %23 = vector.shape_cast %22 : vector<8xf32> to vector<8x1xf32>
    %c2_i32 = arith.constant 2 : i32
    %24 = vector.broadcast %23 : vector<8x1xf32> to vector<8x256xf32>
    %25 = arith.cmpf olt, %10, %24 : vector<8x256xf32>
    %cst_9 = arith.constant 0xFF800000 : f32
    %26 = vector.broadcast %cst_9 : f32 to vector<8x256xf32>
    %27 = arith.select %25, %10, %26 : vector<8x256xi1>, vector<8x256xf32>
    %cst_10 = arith.constant dense<0xFF800000> : vector<8xf32>
    %28 = vector.multi_reduction <maximumf>, %27, %cst_10 [1] : vector<8x256xf32> to vector<8xf32>
    %29 = vector.shape_cast %28 : vector<8xf32> to vector<8x1xf32>
    %c3_i32 = arith.constant 3 : i32
    %30 = vector.broadcast %29 : vector<8x1xf32> to vector<8x256xf32>
    %31 = arith.cmpf olt, %10, %30 : vector<8x256xf32>
    %cst_11 = arith.constant 0xFF800000 : f32
    %32 = vector.broadcast %cst_11 : f32 to vector<8x256xf32>
    %33 = arith.select %31, %10, %32 : vector<8x256xi1>, vector<8x256xf32>
    %cst_12 = arith.constant dense<0xFF800000> : vector<8xf32>
    %34 = vector.multi_reduction <maximumf>, %33, %cst_12 [1] : vector<8x256xf32> to vector<8xf32>
    %35 = vector.shape_cast %34 : vector<8xf32> to vector<8x1xf32>
    %36 = vector.broadcast %35 : vector<8x1xf32> to vector<8x256xf32>
    %37 = arith.cmpf oge, %10, %36 : vector<8x256xf32>
    %cst_13 = arith.constant 0.000000e+00 : f32
    %38 = vector.broadcast %cst_13 : f32 to vector<8x256xf32>
    %39 = arith.select %37, %2, %38 : vector<8x256xi1>, vector<8x256xf32>
    %c0_14 = arith.constant 0 : index
    %c0_15 = arith.constant 0 : index
    %40 = vector.load %arg5[%c0_14, %c0_15] : memref<8x256xf32, #tpu.memory_space<vmem>>, vector<8x256xf32>
    tpu.vector_store %arg5[%c0_14, %c0_15], %39 {strides = array<i32>} : memref<8x256xf32, #tpu.memory_space<vmem>>, vector<8x256xf32>,
    %41 = arith.truncf %39 : vector<8x256xf32> to vector<8x256xbf16>
    %c0_16 = arith.constant 0 : index
    %c0_17 = arith.constant 0 : index
    %42 = vector.load %arg3[%c0_16, %c0_17] : memref<256x256xbf16, #tpu.memory_space<vmem>>, vector<256x256xbf16>
    %cst_18 = arith.constant dense<0.000000e+00> : vector<8x256xf32>
    %43 = tpu.matmul %41, %42, %cst_18 {dimension_numbers = #tpu.dot_dimension_numbers<[1], [0], [0], [1], [0, 0, 1, 1], [], []>} : vector<8x256xbf16>, vector<256x256xbf16>, vector<8x256xf32> -> vector<8x256xf32>
    %c0_19 = arith.constant 0 : index
    %c0_20 = arith.constant 0 : index
    %44 = vector.load %arg4[%c0_19, %c0_20] : memref<8x256xf32, #tpu.memory_space<vmem>>, vector<8x256xf32>
    tpu.vector_store %arg4[%c0_19, %c0_20], %43 {strides = array<i32>} : memref<8x256xf32, #tpu.memory_space<vmem>>, vector<8x256xf32>,
    return
  }
  func.func @transform_0(%arg0: i32) -> (i32, i32) {
    %c0_i32 = arith.constant 0 : i32
    %c0_i32_0 = arith.constant 0 : i32
    return %arg0, %c0_i32 : i32, i32
  }
  func.func @transform_1(%arg0: i32) -> (i32, i32) {
    %c0_i32 = arith.constant 0 : i32
    %c0_i32_0 = arith.constant 0 : i32
    %c0_i32_1 = arith.constant 0 : i32
    return %c0_i32, %c0_i32_0 : i32, i32
  }
  func.func @transform_2(%arg0: i32) -> (i32, i32) {
    %c0_i32 = arith.constant 0 : i32
    %c0_i32_0 = arith.constant 0 : i32
    %c0_i32_1 = arith.constant 0 : i32
    return %c0_i32, %c0_i32_0 : i32, i32
  }
  func.func @transform_3(%arg0: i32) -> (i32, i32) {
    %c0_i32 = arith.constant 0 : i32
    %c0_i32_0 = arith.constant 0 : i32
    return %arg0, %c0_i32 : i32, i32
  }
  func.func @transform_4(%arg0: i32) -> (i32, i32) {
    %c0_i32 = arith.constant 0 : i32
    %c0_i32_0 = arith.constant 0 : i32
    return %arg0, %c0_i32 : i32, i32
  }
}

</mosaic_0001>

<bundles_post_ra>
// kernel: tpu_custom_call.1
= control target key start
LH: loop header
LB: loop body
LE: loop exit
PB: predicated region body
PF: predicated region fallthrough
CT: control target
= control target key end

     0   :  { %10 = vsyncpa [#allocation3], 0  ;;  %s1712_s0 = inlined_call_operand.hbm [shape: bf16[16,256], index: 0, kind: input, shape index: {}]   ;;  %s1713_s1 = inlined_call_operand.hbm [shape: bf16[256,256], index: 1, kind: input, shape index: {}]   ;;  %s1714_s2 = inlined_call_operand.hbm [shape: bf16[256,256], index: 2, kind: input, shape index: {}]   ;;  %s1715_s3 = inlined_call_operand.hbm [shape: f32[16,256], index: 3, kind: output, shape index: {0}]   ;;  %s1716_s4 = inlined_call_operand.hbm [shape: f32[16,256], index: 4, kind: output, shape index: {1}]  }
   0x1   :  { %12 = vsyncpa [#allocation3 + $0x1], 0 }
   0x2   :  { %13 = vsyncpa [#allocation6], 0 }
   0x3   :  { %14 = vsyncpa [#allocation4], 0 }
   0x4   :  { %16 = vsyncpa [#allocation4 + $0x1], 0 }
   0x5   :  { %17 = vsyncpa [#allocation10], 0 }
   0x6   :  { %19 = vsyncpa [#allocation10 + $0x1], 0  ;;  %s1429_s15 = smov 0   ;;  %s1431_s16 = smov 0  }
   0x7   :  { %s1433_s17 = smov 0   ;;  %s1435_s18 = smov 0  }
   0x8 LB: > { %s1450_s19 = sadd.s32 4294967295, %s1395_s18   ;;  %s934_s20 = sadd.s32 4294967294, %s1395_s18   ;;  %s1395_s18 = sphi %s1435_s18, %s1736_s18   ;;  %s1391_s17 = sphi %s1433_s17, %s1735_s17   ;;  %s1387_s16 = sphi %s1431_s16, %s1734_s16   ;;  %s1383_s15 = sphi %s1429_s15, %s1733_s15  }
   0x9   : > { %p45_p0 = scmp.ne.s32.totalorder %s1387_s16, %s1383_s15  ;;  %p1717_p1 = scmp.eq.s32.totalorder %s1450_s19, 0 }
   0xa   : > { %p117_p3 = scmp.eq.s32.totalorder %s934_s20, 1  ;;  %p935_p5 = scmp.ge.s32.totalorder %s1395_s18, 1 }
   0xb   : > { %p1459_p4 = por %p1717_p1, %p45_p0  ;;  %p150_p7 = scmp.lt.s32.totalorder %s1395_s18, 3 }
   0xc   : > { %p1464_p6 = por %p117_p3, %p45_p0  ;;  %s1397_s24 = smov [#allocation5]  }
   0xd   : > { %s1720_s21 = scalar_select %p1459_p4, 1, 0 }
   0xe   : > { %s1721_s22 = scalar_select %p1464_p6, 1, 0 }
   0xf   : > { %p1469_p8 = pnand %p935_p5, %p150_p7  ;;  %s162_s25 = sshll.u32 %s1397_s24, 4  ;;  %s1473_s25 = int_to_ptr.vmem [resolvable:$true] %s162_s25 }
  0x10   : > { %s1398_s27 = smov [#allocation7]   ;;  %s1207_s5 = scalar_lea.hbm %s1713_s1, 4096 }
  0x11   : > { %p1049_p9 = pneg %p1469_p8  ;;  %s175_s28 = sshll.u32 %s1398_s27, 4  ;;  %s1484_s28 = int_to_ptr.vmem [resolvable:$true] %s175_s28 }
  0x12   : > { %p1208_p12 = scmp.ne.s32.totalorder %s1713_s1, %s1207_s5  ;;  %p1214_p5 = scmp.lt.u32.totalorder %s1207_s5, %s1713_s1 }
  0x13   : > { %p1480_p11 = pnand %p1049_p9, %p1717_p1 }
  0x15   : > { %p1209_p13 = pneg %p1480_p11 }
  0x17   : > { %p1210_p0 = pnand %p1209_p13, %p1208_p12 }
  0x19   : > { %p1211_p3 = pneg %p1210_p0 }
  0x1b   : > { %p1216_p7 = pnand %p1214_p5, %p1211_p3 }
  0x1d   : > { %1219 = shalt.err (!%p1216_p7)
}
  0x1e   : > { %s1220_s10 = scalar_lea.vmem %s1473_s25, 4096  ;;  %p1228_p2 = scmp.lt.s32.totalorder %s1473_s25, %s1473_s25 }
  0x1f   : > { %p1221_p9 = scmp.ne.s32.totalorder %s1473_s25, %s1220_s10  ;;  %p1229_p12 = scmp.lt.s32.totalorder %s1220_s10, %s1220_s10 }
  0x21   : > { %p1223_p10 = pnand %p1221_p9, %p1209_p13  ;;  %p1230_p0 = por %p1229_p12, %p1228_p2 }
  0x23   : > { %p1224_p1 = pneg %p1223_p10 }
  0x25   : > { %p1231_p6 = pnand %p1230_p0, %p1224_p1 }
  0x27   : > { %1234 = shalt.err (!%p1231_p6)
}
  0x28   : > { %s1399_s11 = smov 128   ;;  %s1400_s12 = smov 8  }
  0x29   : > { %1052 = dma.hbm_to_vmem [thread:$0]  (!%p1480_p11), %s1713_s1, 4096, %s1473_s25, [#allocation6], %s1399_s11, %s1399_s11, %s1400_s12  }
  0x2a   : > { %s1235_s27 = scalar_lea.hbm %s1714_s2, 4096 }
  0x2b   : > { %p1236_p2 = scmp.ne.s32.totalorder %s1714_s2, %s1235_s27  ;;  %p1242_p10 = scmp.lt.u32.totalorder %s1235_s27, %s1714_s2 }
  0x2d   : > { %p1238_p1 = pnand %p1236_p2, %p1209_p13 }
  0x2f   : > { %p1239_p6 = pneg %p1238_p1 }
  0x31   : > { %p1244_p3 = pnand %p1242_p10, %p1239_p6 }
  0x33   : > { %1247 = shalt.err (!%p1244_p3)
}
  0x34   : > { %s1248_s25 = scalar_lea.vmem %s1484_s28, 4096  ;;  %p1256_p12 = scmp.lt.s32.totalorder %s1484_s28, %s1484_s28 }
  0x35   : > { %p1249_p5 = scmp.ne.s32.totalorder %s1484_s28, %s1248_s25  ;;  %p1257_p0 = scmp.lt.s32.totalorder %s1248_s25, %s1248_s25 }
  0x37   : > { %p1251_p7 = pnand %p1249_p5, %p1209_p13  ;;  %p1258_p2 = por %p1257_p0, %p1256_p12 }
  0x39   : > { %p1252_p9 = pneg %p1251_p7 }
  0x3b   : > { %p1259_p1 = pnand %p1258_p2, %p1252_p9 }
  0x3d   : > { %1262 = shalt.err (!%p1259_p1)
}
  0x3e   : > { %1055 = dma.hbm_to_vmem [thread:$0]  (!%p1480_p11), %s1714_s2, 4096, %s1484_s28, [#allocation6], %s1399_s11, %s1399_s11, %s1400_s12  }
  0x3f   : > { %s1539_s9 = sadd.s32 1, %s1395_s18   ;;  %s32_s26 = sadd.s32 1, %s1391_s17 }
  0x40   : > { %s29_s10 = ssub.s32 %s1395_s18, %s1539_s9  ;;  %p39_p13 = scmp.ne.s32.totalorder %s1391_s17, %s1387_s16 }
  0x41   : > { %p30_p6 = scmp.eq.s32.totalorder %s29_s10, 0  ;;  %p40_p10 = scmp.eq.s32.totalorder %s1395_s18, 0 }
  0x42   : > { %p1724_p3 = scmp.eq.s32.totalorder %s1450_s19, 1  ;;  %p1069_p7 = scmp.lt.s32.totalorder %s1395_s18, 2 }
  0x43   : > { %s1555_s14 = scalar_select %p30_p6, %s1391_s17, %s32_s26  }
  0x44   : > { %p1549_p5 = por %p1724_p3, %p39_p13  ;;  %p41_p9 = por %p40_p10, %p39_p13 }
  0x45   : > { %s189_s20 = sand.u32 1, %s1391_s17   ;;  %s1032_s28 = sshll.u32 %s1395_s18, 7 }
  0x46   : > { %s1725_s13 = scalar_select %p1549_p5, 1, 0 }
  0x47   : > { %s939_s24 = sshll.u32 %s189_s20, 3  ;;  %s1562_s27 = scalar_lea.hbm %s1712_s0, %s1032_s28 }
  0x48   : > { %s193_s29 = scalar_lea.vmem [#allocation2], %s939_s24  ;;  %p1566_p11 = pnand %p1069_p7, %p41_p9 }
  0x49   : > { %s201_s30 = sshll.u32 %s193_s29, 4  ;;  %s190_s6 = scalar_lea.sflag [#allocation3], %s189_s20  ;;  %s1564_s30 = int_to_ptr.vmem [resolvable:$true] %s201_s30 }
  0x4a   : > { %s1263_s25 = scalar_lea.hbm %s1562_s27, 128  ;;  %p1265_p0 = pneg %p1566_p11 }
  0x4b   : > { %p1264_p12 = scmp.ne.s32.totalorder %s1562_s27, %s1263_s25  ;;  %s1268_s26 = scalar_lea.hbm %s1712_s0, 256 }
  0x4c   : > { %p1269_p13 = scmp.lt.u32.totalorder %s1562_s27, %s1712_s0  ;;  %p1270_p6 = scmp.lt.u32.totalorder %s1268_s26, %s1263_s25 }
  0x4d   : > { %p1266_p2 = pnand %p1265_p0, %p1264_p12  ;;  %p1272_p3 = scmp.lt.u32.totalorder %s1263_s25, %s1562_s27 }
  0x4e   : > { %p1271_p10 = por %p1270_p6, %p1269_p13 }
  0x4f   : > { %p1267_p1 = pneg %p1266_p2 }
  0x50   : > { %p1273_p7 = por %p1272_p3, %p1271_p10 }
  0x52   : > { %p1274_p9 = pnand %p1273_p7, %p1267_p1 }
  0x54   : > { %1277 = shalt.err (!%p1274_p9)
}
  0x55   : > { %s1278_s20 = scalar_lea.vmem %s1564_s30, 128  ;;  %s1401_s28 = smov [#allocation2]  }
  0x56   : > { %p1279_p12 = scmp.ne.s32.totalorder %s1564_s30, %s1278_s20  ;;  %s1283_s11 = sshll.u32 %s1401_s28, 4  ;;  %s1284_s11 = int_to_ptr.vmem [resolvable:$false] %s1283_s11 }
  0x57   : > { %s1285_s12 = scalar_lea.vmem %s1284_s11, 256  ;;  %p1286_p4 = scmp.lt.s32.totalorder %s1564_s30, %s1284_s11 }
  0x58   : > { %p1281_p2 = pnand %p1279_p12, %p1265_p0  ;;  %p1287_p13 = scmp.lt.s32.totalorder %s1285_s12, %s1278_s20 }
  0x5a   : > { %p1282_p5 = pneg %p1281_p2  ;;  %p1288_p6 = por %p1287_p13, %p1286_p4 }
  0x5c   : > { %p1289_p10 = pnand %p1288_p6, %p1282_p5 }
  0x5e   : > { %1292 = shalt.err (!%p1289_p10)
}
  0x5f   : > { %1059 = dma.hbm_to_vmem [thread:$0]  (!%p1566_p11), %s1562_s27, 128, %s1564_s30, %s190_s6  }
  0x60   : > { %210 = sbr.rel (%p1469_p8) target bundleno = 1196 (0x4ac), region = 32  ;;  %s1598_s29 = sand.u32 (!%p1469_p8), 1, %s1387_s16  }
  0x61   : > { %s943_s25 = sshll.u32 (!%p1469_p8), %s1598_s29, 3  ;;  %s213_s7 = scalar_lea.sflag (!%p1469_p8), [#allocation3], %s1598_s29 }
  0x62   : > { %s216_s8 = scalar_lea.vmem (!%p1469_p8), [#allocation2], %s943_s25  ;;  %p1727_p4 = scmp.ne.s32.totalorder (!%p1469_p8), %s1720_s21, 0 }
  0x67   : > { %1366 = dma.done.wait (%p1727_p4), %s213_s7, 128  }
  0x68   : > { %1368 = vsyncadd (%p1727_p4), %s213_s7, 4294967168  ;;  %p1728_p5 = scmp.eq.s32.totalorder %s1450_s19, 0 }
  0x6a   : > { %1370 = dma.done.wait (%p1728_p5), [#allocation6], 8192   ;;  %p1729_p11 = pmov %p1728_p5 }
  0x6b   : > { %v1109_v0 = vld [vmem:[#allocation5 + $0x4] ss:$8 sps:$4 sm:$0xff]   ;;  %v1111_v1 = vld [vmem:[#allocation5] ss:$8 sps:$4 sm:$0xff]   ;;  %v1112_v2 = vld [vmem:[#allocation5 + $0x14] ss:$8 sps:$4 sm:$0xff]   ;;  %v497_v35 = vlaneseq }
  0x6c   : > { %1372 = vsyncadd (%p1729_p11), [#allocation6], 4294959104  ;;  %454 = vmatprep.subr.bf16.mxu0 %v1109_v0  ;;  %v1114_v3 = vld [vmem:[#allocation5 + $0x10] ss:$8 sps:$4 sm:$0xff]   ;;  %v1115_v4 = vld [vmem:[#allocation5 + $0x24] ss:$8 sps:$4 sm:$0xff]  }
  0x6d   : > { %455 = vmatpush1.bf16.msra.mxu0 %v1111_v1  ;;  %v1117_v5 = vld [vmem:[#allocation5 + $0x20] ss:$8 sps:$4 sm:$0xff]   ;;  %v1118_v6 = vld [vmem:[#allocation5 + $0x34] ss:$8 sps:$4 sm:$0xff]   ;;  %v1120_v7 = vld [vmem:[#allocation5 + $0x30] ss:$8 sps:$4 sm:$0xff]  }
  0x6e   : > { %456 = vmatprep.subr.bf16.mxu0 %v1112_v2  ;;  %v1121_v8 = vld [vmem:[#allocation5 + $0x44] ss:$8 sps:$4 sm:$0xff]   ;;  %v1123_v9 = vld [vmem:[#allocation5 + $0x40] ss:$8 sps:$4 sm:$0xff]   ;;  %v1124_v10 = vld [vmem:[#allocation5 + $0x54] ss:$8 sps:$4 sm:$0xff]  }
  0x6f   : > { %v1126_v11 = vld [vmem:[#allocation5 + $0x50] ss:$8 sps:$4 sm:$0xff]   ;;  %v1127_v12 = vld [vmem:[#allocation5 + $0x64] ss:$8 sps:$4 sm:$0xff]   ;;  %v1129_v13 = vld [vmem:[#allocation5 + $0x60] ss:$8 sps:$4 sm:$0xff]  }
  0x70   : > { %v254_v14 = vld [vmem:[%s216_s8] sm:$0xff]  ;;  %v1133_v18 = vld [vmem:[#allocation5 + $0x84] ss:$8 sps:$4 sm:$0xff]   ;;  %v1135_v19 = vld [vmem:[#allocation5 + $0x80] ss:$8 sps:$4 sm:$0xff]   ;;  %v498_v36 = vand.u32 127, %v497_v35 }
  0x71   : > { %457 = vmatpush1.bf16.msra.mxu0 %v1114_v3  ;;  %v1130_v15 = vld [vmem:[#allocation5 + $0x74] ss:$8 sps:$4 sm:$0xff]   ;;  %v949_v16 = vcombine.high %v254_v14, %v254_v14  ;;  %v1132_v17 = vld [vmem:[#allocation5 + $0x70] ss:$8 sps:$4 sm:$0xff]   ;;  %v1139_v22 = vld [vmem:[#allocation5 + $0xa4] ss:$8 sps:$4 sm:$0xff]   ;;  %v948_v34 = vcombine.low %v254_v14, %v254_v14 }
  0x72   : > { %458 = vmatprep.subr.bf16.mxu0 %v1115_v4  ;;  %v1136_v20 = vld [vmem:[#allocation5 + $0x94] ss:$8 sps:$4 sm:$0xff]   ;;  %v1138_v21 = vld [vmem:[#allocation5 + $0x90] ss:$8 sps:$4 sm:$0xff]   ;;  %v1141_v23 = vld [vmem:[#allocation5 + $0xa0] ss:$8 sps:$4 sm:$0xff]  }
  0x73   : > { %486 = vmatprep.mubr.bf16.mxu0 %v949_v16  ;;  %v1142_v24 = vld [vmem:[#allocation5 + $0xb4] ss:$8 sps:$4 sm:$0xff]   ;;  %v1144_v25 = vld [vmem:[#allocation5 + $0xb0] ss:$8 sps:$4 sm:$0xff]   ;;  %v1145_v26 = vld [vmem:[#allocation5 + $0xc4] ss:$8 sps:$4 sm:$0xff]  }
  0x74   : > { %v1147_v27 = vld [vmem:[#allocation5 + $0xc0] ss:$8 sps:$4 sm:$0xff]   ;;  %v1148_v28 = vld [vmem:[#allocation5 + $0xd4] ss:$8 sps:$4 sm:$0xff]   ;;  %v1150_v29 = vld [vmem:[#allocation5 + $0xd0] ss:$8 sps:$4 sm:$0xff]  }
  0x75   : > { %459 = vmatpush1.bf16.msra.mxu0 %v1117_v5  ;;  %v1151_v30 = vld [vmem:[#allocation5 + $0xe4] ss:$8 sps:$4 sm:$0xff]   ;;  %v1153_v31 = vld [vmem:[#allocation5 + $0xe0] ss:$8 sps:$4 sm:$0xff]   ;;  %v1154_v32 = vld [vmem:[#allocation5 + $0xf4] ss:$8 sps:$4 sm:$0xff]  }
  0x76   : > { %460 = vmatprep.subr.bf16.mxu0 %v1118_v6  ;;  %v1156_v33 = vld [vmem:[#allocation5 + $0xf0] ss:$8 sps:$4 sm:$0xff]   ;;  %vm500_vm0 = vcmp.lt.s32.totalorder %v498_v36, 64  ;;  %v1159_v48 = vld [vmem:[#allocation7 + $0x4] ss:$8 sps:$4 sm:$0xff]   ;;  %s946_s21 = sshll.u32 %s1598_s29, 4 }
  0x77   : > { %v1161_v49 = vld [vmem:[#allocation7] ss:$8 sps:$4 sm:$0xff]   ;;  %v1162_v50 = vld [vmem:[#allocation7 + $0x14] ss:$8 sps:$4 sm:$0xff]   ;;  %736 = vmatprep.subr.bf16.mxu1 %v1159_v48  ;;  %v1164_v51 = vld [vmem:[#allocation7 + $0x10] ss:$8 sps:$4 sm:$0xff]  }
  0x78   : > { %737 = vmatpush1.bf16.msra.mxu1 %v1161_v49  ;;  %v1165_v52 = vld [vmem:[#allocation7 + $0x24] ss:$8 sps:$4 sm:$0xff]   ;;  %v1167_v53 = vld [vmem:[#allocation7 + $0x20] ss:$8 sps:$4 sm:$0xff]   ;;  %v1168_v54 = vld [vmem:[#allocation7 + $0x34] ss:$8 sps:$4 sm:$0xff]  }
  0x79   : > { %461 = vmatpush1.bf16.msra.mxu0 %v1120_v7  ;;  %738 = vmatprep.subr.bf16.mxu1 %v1162_v50  ;;  %v1170_v55 = vld [vmem:[#allocation7 + $0x30] ss:$8 sps:$4 sm:$0xff]   ;;  %v1171_v56 = vld [vmem:[#allocation7 + $0x44] ss:$8 sps:$4 sm:$0xff]   ;;  %v1173_v57 = vld [vmem:[#allocation7 + $0x40] ss:$8 sps:$4 sm:$0xff]  }
  0x7a   : > { %462 = vmatprep.subr.bf16.mxu0 %v1121_v8  ;;  %v1174_v58 = vld [vmem:[#allocation7 + $0x54] ss:$8 sps:$4 sm:$0xff]   ;;  %v1176_v59 = vld [vmem:[#allocation7 + $0x50] ss:$8 sps:$4 sm:$0xff]   ;;  %v1177_v60 = vld [vmem:[#allocation7 + $0x64] ss:$8 sps:$4 sm:$0xff]  }
  0x7b   : > { %v1179_v61 = vld [vmem:[#allocation7 + $0x60] ss:$8 sps:$4 sm:$0xff]   ;;  %v1180_v62 = vld [vmem:[#allocation7 + $0x74] ss:$8 sps:$4 sm:$0xff]   ;;  %v1182_v63 = vld [vmem:[#allocation7 + $0x70] ss:$8 sps:$4 sm:$0xff]  }
  0x7c   : > { %739 = vmatpush1.bf16.msra.mxu1 %v1164_v51  ;;  %v1183_v0 = vld [vmem:[#allocation7 + $0x84] ss:$8 sps:$4 sm:$0xff]   ;;  %v1185_v1 = vld [vmem:[#allocation7 + $0x80] ss:$8 sps:$4 sm:$0xff]   ;;  %v1186_v2 = vld [vmem:[#allocation7 + $0x94] ss:$8 sps:$4 sm:$0xff]  }
  0x7d   : > { %463 = vmatpush1.bf16.msra.mxu0 %v1123_v9  ;;  %740 = vmatprep.subr.bf16.mxu1 %v1165_v52  ;;  %v1188_v3 = vld [vmem:[#allocation7 + $0x90] ss:$8 sps:$4 sm:$0xff]   ;;  %v1189_v4 = vld [vmem:[#allocation7 + $0xa4] ss:$8 sps:$4 sm:$0xff]   ;;  %v1191_v5 = vld [vmem:[#allocation7 + $0xa0] ss:$8 sps:$4 sm:$0xff]  }
  0x7e   : > { %464 = vmatprep.subr.bf16.mxu0 %v1124_v10  ;;  %v1192_v6 = vld [vmem:[#allocation7 + $0xb4] ss:$8 sps:$4 sm:$0xff]   ;;  %v1194_v7 = vld [vmem:[#allocation7 + $0xb0] ss:$8 sps:$4 sm:$0xff]   ;;  %v1195_v8 = vld [vmem:[#allocation7 + $0xc4] ss:$8 sps:$4 sm:$0xff]  }
  0x7f   : > { %v1197_v9 = vld [vmem:[#allocation7 + $0xc0] ss:$8 sps:$4 sm:$0xff]   ;;  %v1198_v10 = vld [vmem:[#allocation7 + $0xd4] ss:$8 sps:$4 sm:$0xff]   ;;  %s253_s23 = scalar_lea.vmem [#allocation9], %s946_s21  ;;  %s1033_s30 = sshll.u32 %s1450_s19, 8 }
  0x80   : > { %741 = vmatpush1.bf16.msra.mxu1 %v1167_v53  ;;  %v1204_v14 = vld [vmem:[#allocation7 + $0xf4] ss:$8 sps:$4 sm:$0xff]   ;;  %s813_s27 = sshll.u32 %s253_s23, 4  ;;  %s1641_s26 = scalar_lea.hbm %s1716_s4, %s1033_s30  ;;  %s814_s27 = int_to_ptr.vmem [resolvable:$true] %s813_s27 }
  0x81   : > { %465 = vmatpush1.bf16.msra.mxu0 %v1126_v11  ;;  %742 = vmatprep.subr.bf16.mxu1 %v1168_v54  ;;  %v1200_v11 = vld [vmem:[#allocation7 + $0xd0] ss:$8 sps:$4 sm:$0xff]   ;;  %s785_s10 = scalar_lea.sflag [#allocation10], %s1598_s29  ;;  %s1293_s24 = scalar_lea.vmem %s814_s27, 256 }
  0x82   : > { %466 = vmatprep.subr.bf16.mxu0 %v1127_v12  ;;  %v1201_v12 = vld [vmem:[#allocation7 + $0xe4] ss:$8 sps:$4 sm:$0xff]   ;;  %p1294_p8 = scmp.ne.s32.totalorder %s814_s27, %s1293_s24  ;;  %p1730_p0 = scmp.ne.s32.totalorder %s1725_s13, 0 }
  0x83   : > { %s1402_s20 = smov [#allocation9]  }
  0x84   : > { %743 = vmatpush1.bf16.msra.mxu1 %v1170_v55  ;;  %p1295_p1 = pnand %p1294_p8, %p1730_p0  ;;  %s1297_s28 = sshll.u32 %s1402_s20, 4  ;;  %s1298_s28 = int_to_ptr.vmem [resolvable:$false] %s1297_s28 }
  0x85   : > { %467 = vmatpush1.bf16.msra.mxu0 %v1129_v13  ;;  %744 = vmatprep.subr.bf16.mxu1 %v1171_v56  ;;  %v1203_v13 = vld [vmem:[#allocation7 + $0xe0] ss:$8 sps:$4 sm:$0xff]   ;;  %s1299_s11 = scalar_lea.vmem %s1298_s28, 512  ;;  %p1300_p7 = scmp.lt.s32.totalorder %s814_s27, %s1298_s28 }
  0x86   : > { %468 = vmatprep.subr.bf16.mxu0 %v1130_v15  ;;  %p1296_p3 = pneg %p1295_p1  ;;  %p1301_p9 = scmp.lt.s32.totalorder %s1299_s11, %s1293_s24 }
  0x88   : > { %745 = vmatpush1.bf16.msra.mxu1 %v1173_v57  ;;  %p1302_p12 = por %p1301_p9, %p1300_p7 }
  0x89   : > { %469 = vmatpush1.bf16.msra.mxu0 %v1132_v17  ;;  %746 = vmatprep.subr.bf16.mxu1 %v1174_v58  ;;  %v1206_v17 = vld [vmem:[#allocation7 + $0xf0] ss:$8 sps:$4 sm:$0xff]  }
  0x8a   : > { %470 = vmatprep.subr.bf16.mxu0 %v1133_v18  ;;  %p1303_p2 = pnand %p1302_p12, %p1296_p3 }
  0x8c   : > { %747 = vmatpush1.bf16.msra.mxu1 %v1176_v59 }
  0x8d   : > { %471 = vmatpush1.bf16.msra.mxu0 %v1135_v19  ;;  %748 = vmatprep.subr.bf16.mxu1 %v1177_v60 }
  0x8e   : > { %472 = vmatprep.subr.bf16.mxu0 %v1136_v20 }
  0x90   : > { %749 = vmatpush1.bf16.msra.mxu1 %v1179_v61 }
  0x91   : > { %473 = vmatpush1.bf16.msra.mxu0 %v1138_v21  ;;  %750 = vmatprep.subr.bf16.mxu1 %v1180_v62 }
  0x92   : > { %474 = vmatprep.subr.bf16.mxu0 %v1139_v22 }
  0x94   : > { %751 = vmatpush1.bf16.msra.mxu1 %v1182_v63 }
  0x95   : > { %475 = vmatpush1.bf16.msra.mxu0 %v1141_v23  ;;  %752 = vmatprep.subr.bf16.mxu1 %v1183_v0 }
  0x96   : > { %476 = vmatprep.subr.bf16.mxu0 %v1142_v24 }
  0x98   : > { %753 = vmatpush1.bf16.msra.mxu1 %v1185_v1 }
  0x99   : > { %477 = vmatpush1.bf16.msra.mxu0 %v1144_v25  ;;  %754 = vmatprep.subr.bf16.mxu1 %v1186_v2 }
  0x9a   : > { %478 = vmatprep.subr.bf16.mxu0 %v1145_v26 }
  0x9c   : > { %755 = vmatpush1.bf16.msra.mxu1 %v1188_v3 }
  0x9d   : > { %479 = vmatpush1.bf16.msra.mxu0 %v1147_v27  ;;  %756 = vmatprep.subr.bf16.mxu1 %v1189_v4 }
  0x9e   : > { %480 = vmatprep.subr.bf16.mxu0 %v1148_v28 }
  0xa0   : > { %757 = vmatpush1.bf16.msra.mxu1 %v1191_v5 }
  0xa1   : > { %481 = vmatpush1.bf16.msra.mxu0 %v1150_v29  ;;  %758 = vmatprep.subr.bf16.mxu1 %v1192_v6 }
  0xa2   : > { %482 = vmatprep.subr.bf16.mxu0 %v1151_v30 }
  0xa4   : > { %759 = vmatpush1.bf16.msra.mxu1 %v1194_v7 }
  0xa5   : > { %483 = vmatpush1.bf16.msra.mxu0 %v1153_v31  ;;  %760 = vmatprep.subr.bf16.mxu1 %v1195_v8 }
  0xa6   : > { %484 = vmatprep.subr.bf16.mxu0 %v1154_v32 }
  0xa8   : > { %761 = vmatpush1.bf16.msra.mxu1 %v1197_v9 }
  0xa9   : > { %485 = vmatpush1.bf16.msra.mxu0 %v1156_v33  ;;  %762 = vmatprep.subr.bf16.mxu1 %v1198_v10 }
  0xac   : > { %487 = vmatmul.mubr.bf16.vlgmr.msra.gmra.mrb[0].mxu0 %v948_v34  ;;  %763 = vmatpush1.bf16.msra.mxu1 %v1200_v11 }
  0xad   : > { %764 = vmatprep.subr.bf16.mxu1 %v1201_v12 }
  0xb0   : > { %765 = vmatpush1.bf16.msra.mxu1 %v1203_v13 }
  0xb1   : > { %766 = vmatprep.subr.bf16.mxu1 %v1204_v14 }
  0xb4   : > { %767 = vmatpush1.bf16.msra.mxu1 %v1206_v17 }
 0x17f   : > { %v1610_v37 = vpop.f32.mrb[0].mxu0 }
 0x180   : > { %v495_v38 = vand.u32 2147483647, %v1610_v37  ;;  %v1613_v39 = vpop.f32.mrb[1].mxu0  ;;  %v1022_v22 = vpack.c.bf16 %v1610_v37, %v1610_v37 }
 0x181   : > { %v492_v40 = vpop.f32.mrb[2].mxu0  ;;  %v1019_v21 = vpack.c.bf16 %v1613_v39, %v1613_v39 }
 0x182   : > { %v1615_v41 = vsel %vm500_vm0, %v495_v38, -inf  ;;  %v493_v42 = vpop.f32.mrb[3].mxu0 }
 0x183   : > { %vm508_vm1 = vcmp.lt.f32.partialorder %v1615_v41, inf }
 0x184   : > { %v510_v43 = vsel %vm508_vm1, %v1615_v41, -inf }
 0x185   : > { %513 = vmax.xlane.f32.xlu0 %v510_v43 }
 0x212   : > { %v514_v44 = vpop.xlane.xlu0 %513 }
 0x213   : > { %vm515_vm2 = vcmp.lt.f32.partialorder %v1615_v41, %v514_v44 }
 0x214   : > { %v517_v45 = vsel %vm515_vm2, %v1615_v41, -inf }
 0x215   : > { %520 = vmax.xlane.f32.xlu0 %v517_v45 }
 0x2a2   : > { %v521_v46 = vpop.xlane.xlu0 %520 }
 0x2a3   : > { %vm522_vm3 = vcmp.lt.f32.partialorder %v1615_v41, %v521_v46 }
 0x2a4   : > { %v524_v47 = vsel %vm522_vm3, %v1615_v41, -inf }
 0x2a5   : > { %527 = vmax.xlane.f32.xlu1 %v524_v47 }
 0x332   : > { %v528_v15 = vpop.xlane.xlu1 %527 }
 0x333   : > { %vm529_vm4 = vcmp.lt.f32.partialorder %v1615_v41, %v528_v15 }
 0x334   : > { %v531_v16 = vsel %vm529_vm4, %v1615_v41, -inf }
 0x335   : > { %534 = vmax.xlane.f32.xlu1 %v531_v16 }
 0x3c2   : > { %v535_v18 = vpop.xlane.xlu1 %534 }
 0x3c3   : > { %vm536_vm5 = vcmp.ge.f32.partialorder %v1615_v41, %v535_v18  ;;  %vm985_vm6 = vcmp.le.f32.partialorder %v535_v18, -inf }
 0x3c4   : > { %v538_v19 = vsel %vm536_vm5, %v1610_v37, 0.0  ;;  %v539_v20 = vsel %vm985_vm6, %v1613_v39, 0.0  ;;  %vm1021_vm7 = vmpackc.low %vm536_vm5, %vm536_vm5 }
 0x3c5   : > { %540 = vst [vmem:[%s253_s23] sm:$0xff] %v538_v19  ;;  %541 = vst [vmem:[%s253_s23 + $0x8] sm:$0xff] %v539_v20 }
 0x3c6   : > { %vm1018_vm8 = vmpackc.low %vm985_vm6, %vm985_vm6 }
 0x3c7   : > { %1020 = vmatprep.mubr.msk.bf16.mxu1 %vm1018_vm8, %v1019_v21 }
 0x3c8   : > { %1023 = vmatmul.mubr.msk.bf16.vlgmr.msra.gmra.mrb[0].mxu1 %vm1021_vm7, %v1022_v22 }
 0x3c9   : > { %1306 = shalt.err (!%p1303_p2)
}
 0x3ca   : > { %s1307_s12 = scalar_lea.hbm %s1641_s26, 256  ;;  %s1311_s8 = scalar_lea.hbm %s1716_s4, 512 }
 0x3cb   : > { %p1308_p13 = scmp.ne.s32.totalorder %s1641_s26, %s1307_s12  ;;  %p1312_p4 = scmp.lt.u32.totalorder %s1641_s26, %s1716_s4 }
 0x3cc   : > { %p1313_p5 = scmp.lt.u32.totalorder %s1311_s8, %s1307_s12  ;;  %p1315_p8 = scmp.lt.u32.totalorder %s1307_s12, %s1641_s26 }
 0x3cd   : > { %p1309_p6 = pnand %p1308_p13, %p1730_p0 }
 0x3ce   : > { %p1314_p11 = por %p1313_p5, %p1312_p4 }
 0x3cf   : > { %p1310_p10 = pneg %p1309_p6 }
 0x3d0   : > { %p1316_p1 = por %p1315_p8, %p1314_p11 }
 0x3d2   : > { %p1317_p3 = pnand %p1316_p1, %p1310_p10 }
 0x3d4   : > { %1320 = shalt.err (!%p1317_p3)
}
 0x3d5   : > { %1046 = dma.vmem_to_hbm [thread:$0]  (%p1730_p0), %s814_s27, 256, %s1641_s26, %s785_s10  }
 0x3d6   : > { %s246_s6 = scalar_lea.vmem [#allocation8], %s946_s21  ;;  %s1670_s11 = scalar_lea.hbm %s1715_s3, %s1033_s30 }
 0x3d7   : > { %s799_s24 = sshll.u32 %s246_s6, 4  ;;  %s780_s27 = scalar_lea.sflag [#allocation4], %s1598_s29  ;;  %s1663_s24 = int_to_ptr.vmem [resolvable:$true] %s799_s24 }
 0x3d8   : > { %s1321_s21 = scalar_lea.vmem %s1663_s24, 256  ;;  %s1403_s26 = smov [#allocation8]  }
 0x3d9   : > { %p1322_p7 = scmp.ne.s32.totalorder %s1663_s24, %s1321_s21  ;;  %s1325_s10 = sshll.u32 %s1403_s26, 4  ;;  %s1326_s10 = int_to_ptr.vmem [resolvable:$false] %s1325_s10 }
 0x3da   : > { %s1327_s19 = scalar_lea.vmem %s1326_s10, 512  ;;  %p1328_p2 = scmp.lt.s32.totalorder %s1663_s24, %s1326_s10 }
 0x3db   : > { %p1323_p9 = pnand %p1322_p7, %p1730_p0  ;;  %p1329_p13 = scmp.lt.s32.totalorder %s1327_s19, %s1321_s21 }
 0x3dd   : > { %p1324_p12 = pneg %p1323_p9  ;;  %p1330_p6 = por %p1329_p13, %p1328_p2 }
 0x3df   : > { %p1331_p10 = pnand %p1330_p6, %p1324_p12 }
 0x49b   : > { %v770_v23 = vpop.f32.mrb[0].mxu1 }
 0x49c   : > { %777 = vst [vmem:[%s246_s6] sm:$0xff] %v770_v23  ;;  %v772_v24 = vpop.f32.mrb[1].mxu1 }
 0x49d   : > { %778 = vst [vmem:[%s246_s6 + $0x8] sm:$0xff] %v772_v24  ;;  %v774_v25 = vpop.f32.mrb[2].mxu1 }
 0x49e   : > { %v775_v26 = vpop.f32.mrb[3].mxu1 }
 0x49f   : > { %1334 = shalt.err (!%p1331_p10)
}
 0x4a0   : > { %s1335_s29 = scalar_lea.hbm %s1670_s11, 256  ;;  %s1339_s25 = scalar_lea.hbm %s1715_s3, 512 }
 0x4a1   : > { %p1336_p4 = scmp.ne.s32.totalorder %s1670_s11, %s1335_s29  ;;  %p1340_p8 = scmp.lt.u32.totalorder %s1670_s11, %s1715_s3 }
 0x4a2   : > { %p1341_p1 = scmp.lt.u32.totalorder %s1339_s25, %s1335_s29  ;;  %p1343_p7 = scmp.lt.u32.totalorder %s1335_s29, %s1670_s11 }
 0x4a3   : > { %p1337_p5 = pnand %p1336_p4, %p1730_p0 }
 0x4a4   : > { %p1342_p3 = por %p1341_p1, %p1340_p8 }
 0x4a5   : > { %p1338_p11 = pneg %p1337_p5 }
 0x4a6   : > { %p1344_p9 = por %p1343_p7, %p1342_p3 }
 0x4a8   : > { %p1345_p12 = pnand %p1344_p9, %p1338_p11 }
 0x4aa   : > { %1348 = shalt.err (!%p1345_p12)
}
 0x4ab   : > { %1045 = dma.vmem_to_hbm [thread:$0]  (%p1730_p0), %s1663_s24, 256, %s1670_s11, %s780_s27  }
 0x4ac PF: > { %s825_s23 = sand.u32 1, %s1383_s15   ;;  %p1731_p2 = scmp.ne.s32.totalorder %s1721_s22, 0 }
 0x4ad   : > { %p1732_p13 = scmp.ge.s32.totalorder %s1395_s18, 2  ;;  %s826_s5 = scalar_lea.sflag [#allocation4], %s825_s23 }
 0x4af   : > { %p1061_p6 = pnand %p1732_p13, %p1731_p2 }
 0x4b1   : > { %1374 = dma.done.wait (!%p1061_p6), %s826_s5, 256  }
 0x4b2   : > { %1376 = vsyncadd (!%p1061_p6), %s826_s5, 4294967040  ;;  %s835_s6 = scalar_lea.sflag [#allocation10], %s825_s23 }
 0x4b3   : > { %1378 = dma.done.wait (!%p1061_p6), %s835_s6, 256  }
 0x4b4   : > { %1380 = vsyncadd (!%p1061_p6), %s835_s6, 4294967040  ;;  %p22_p0 = scmp.ge.s32.totalorder %s1539_s9, 4   ;;  %s1733_s15 = smov %s1387_s16 }
 0x4b5   : > { %s1734_s16 = smov %s1391_s17  ;;  %s1735_s17 = smov %s1555_s14 }
 0x4b6   : > { %s1736_s18 = smov %s1539_s9  ;;  %24 = sbr.rel (!%p22_p0) target bundleno = 8 (0x8), region = 102 }
 0x4bd   :  { %840 = vsyncpa [#allocation3], 1 }
 0x4be   :  { %842 = vsyncpa [#allocation3 + $0x1], 1 }
 0x4bf   :  { %843 = vsyncpa [#allocation6], 1 }
 0x4c0   :  { %844 = vsyncpa [#allocation4], 1 }
 0x4c1   :  { %846 = vsyncpa [#allocation4 + $0x1], 1 }
 0x4c2   :  { %847 = vsyncpa [#allocation10], 1 }
 0x4c3   :  { %849 = vsyncpa [#allocation10 + $0x1], 1 }

// kernel: tpu_custom_call.1
= control target key start
LH: loop header
LB: loop body
LE: loop exit
PB: predicated region body
PF: predicated region fallthrough
CT: control target
= control target key end

     0   :  { %10 = vsyncpa [#allocation3], 0  ;;  %s1712_s0 = inlined_call_operand.hbm [shape: bf16[16,256], index: 0, kind: input, shape index: {}]   ;;  %s1713_s1 = inlined_call_operand.hbm [shape: bf16[256,256], index: 1, kind: input, shape index: {}]   ;;  %s1714_s2 = inlined_call_operand.hbm [shape: bf16[256,256], index: 2, kind: input, shape index: {}]   ;;  %s1715_s3 = inlined_call_operand.hbm [shape: f32[16,256], index: 3, kind: output, shape index: {0}]   ;;  %s1716_s4 = inlined_call_operand.hbm [shape: f32[16,256], index: 4, kind: output, shape index: {1}]  }
   0x1   :  { %12 = vsyncpa [#allocation3 + $0x1], 0 }
   0x2   :  { %13 = vsyncpa [#allocation6], 0 }
   0x3   :  { %14 = vsyncpa [#allocation4], 0 }
   0x4   :  { %16 = vsyncpa [#allocation4 + $0x1], 0 }
   0x5   :  { %17 = vsyncpa [#allocation10], 0 }
   0x6   :  { %19 = vsyncpa [#allocation10 + $0x1], 0  ;;  %s1429_s15 = smov 0   ;;  %s1431_s16 = smov 0  }
   0x7   :  { %s1433_s17 = smov 0   ;;  %s1435_s18 = smov 0  }
   0x8 LB: > { %s1450_s19 = sadd.s32 4294967295, %s1395_s18   ;;  %s934_s20 = sadd.s32 4294967294, %s1395_s18   ;;  %s1395_s18 = sphi %s1435_s18, %s1736_s18   ;;  %s1391_s17 = sphi %s1433_s17, %s1735_s17   ;;  %s1387_s16 = sphi %s1431_s16, %s1734_s16   ;;  %s1383_s15 = sphi %s1429_s15, %s1733_s15  }
   0x9   : > { %p45_p0 = scmp.ne.s32.totalorder %s1387_s16, %s1383_s15  ;;  %p1717_p1 = scmp.eq.s32.totalorder %s1450_s19, 0 }
   0xa   : > { %p117_p3 = scmp.eq.s32.totalorder %s934_s20, 1  ;;  %p935_p5 = scmp.ge.s32.totalorder %s1395_s18, 1 }
   0xb   : > { %p1459_p4 = por %p1717_p1, %p45_p0  ;;  %p150_p7 = scmp.lt.s32.totalorder %s1395_s18, 3 }
   0xc   : > { %p1464_p6 = por %p117_p3, %p45_p0  ;;  %s1397_s24 = smov [#allocation5]  }
   0xd   : > { %s1720_s21 = scalar_select %p1459_p4, 1, 0 }
   0xe   : > { %s1721_s22 = scalar_select %p1464_p6, 1, 0 }
   0xf   : > { %p1469_p8 = pnand %p935_p5, %p150_p7  ;;  %s162_s25 = sshll.u32 %s1397_s24, 4  ;;  %s1473_s25 = int_to_ptr.vmem [resolvable:$true] %s162_s25 }
  0x10   : > { %s1398_s27 = smov [#allocation7]   ;;  %s1207_s5 = scalar_lea.hbm %s1713_s1, 4096 }
  0x11   : > { %p1049_p9 = pneg %p1469_p8  ;;  %s175_s28 = sshll.u32 %s1398_s27, 4  ;;  %s1484_s28 = int_to_ptr.vmem [resolvable:$true] %s175_s28 }
  0x12   : > { %p1208_p12 = scmp.ne.s32.totalorder %s1713_s1, %s1207_s5  ;;  %p1214_p5 = scmp.lt.u32.totalorder %s1207_s5, %s1713_s1 }
  0x13   : > { %p1480_p11 = pnand %p1049_p9, %p1717_p1 }
  0x15   : > { %p1209_p13 = pneg %p1480_p11 }
  0x17   : > { %p1210_p0 = pnand %p1209_p13, %p1208_p12 }
  0x19   : > { %p1211_p3 = pneg %p1210_p0 }
  0x1b   : > { %p1216_p7 = pnand %p1214_p5, %p1211_p3 }
  0x1d   : > { %1219 = shalt.err (!%p1216_p7)
}
  0x1e   : > { %s1220_s10 = scalar_lea.vmem %s1473_s25, 4096  ;;  %p1228_p2 = scmp.lt.s32.totalorder %s1473_s25, %s1473_s25 }
  0x1f   : > { %p1221_p9 = scmp.ne.s32.totalorder %s1473_s25, %s1220_s10  ;;  %p1229_p12 = scmp.lt.s32.totalorder %s1220_s10, %s1220_s10 }
  0x21   : > { %p1223_p10 = pnand %p1221_p9, %p1209_p13  ;;  %p1230_p0 = por %p1229_p12, %p1228_p2 }
  0x23   : > { %p1224_p1 = pneg %p1223_p10 }
  0x25   : > { %p1231_p6 = pnand %p1230_p0, %p1224_p1 }
  0x27   : > { %1234 = shalt.err (!%p1231_p6)
}
  0x28   : > { %s1399_s11 = smov 128   ;;  %s1400_s12 = smov 8  }
  0x29   : > { %1052 = dma.hbm_to_vmem [thread:$0]  (!%p1480_p11), %s1713_s1, 4096, %s1473_s25, [#allocation6], %s1399_s11, %s1399_s11, %s1400_s12  }
  0x2a   : > { %s1235_s27 = scalar_lea.hbm %s1714_s2, 4096 }
  0x2b   : > { %p1236_p2 = scmp.ne.s32.totalorder %s1714_s2, %s1235_s27  ;;  %p1242_p10 = scmp.lt.u32.totalorder %s1235_s27, %s1714_s2 }
  0x2d   : > { %p1238_p1 = pnand %p1236_p2, %p1209_p13 }
  0x2f   : > { %p1239_p6 = pneg %p1238_p1 }
  0x31   : > { %p1244_p3 = pnand %p1242_p10, %p1239_p6 }
  0x33   : > { %1247 = shalt.err (!%p1244_p3)
}
  0x34   : > { %s1248_s25 = scalar_lea.vmem %s1484_s28, 4096  ;;  %p1256_p12 = scmp.lt.s32.totalorder %s1484_s28, %s1484_s28 }
  0x35   : > { %p1249_p5 = scmp.ne.s32.totalorder %s1484_s28, %s1248_s25  ;;  %p1257_p0 = scmp.lt.s32.totalorder %s1248_s25, %s1248_s25 }
  0x37   : > { %p1251_p7 = pnand %p1249_p5, %p1209_p13  ;;  %p1258_p2 = por %p1257_p0, %p1256_p12 }
  0x39   : > { %p1252_p9 = pneg %p1251_p7 }
  0x3b   : > { %p1259_p1 = pnand %p1258_p2, %p1252_p9 }
  0x3d   : > { %1262 = shalt.err (!%p1259_p1)
}
  0x3e   : > { %1055 = dma.hbm_to_vmem [thread:$0]  (!%p1480_p11), %s1714_s2, 4096, %s1484_s28, [#allocation6], %s1399_s11, %s1399_s11, %s1400_s12  }
  0x3f   : > { %s1539_s9 = sadd.s32 1, %s1395_s18   ;;  %s32_s26 = sadd.s32 1, %s1391_s17 }
  0x40   : > { %s29_s10 = ssub.s32 %s1395_s18, %s1539_s9  ;;  %p39_p13 = scmp.ne.s32.totalorder %s1391_s17, %s1387_s16 }
  0x41   : > { %p30_p6 = scmp.eq.s32.totalorder %s29_s10, 0  ;;  %p40_p10 = scmp.eq.s32.totalorder %s1395_s18, 0 }
  0x42   : > { %p1724_p3 = scmp.eq.s32.totalorder %s1450_s19, 1  ;;  %p1069_p7 = scmp.lt.s32.totalorder %s1395_s18, 2 }
  0x43   : > { %s1555_s14 = scalar_select %p30_p6, %s1391_s17, %s32_s26  }
  0x44   : > { %p1549_p5 = por %p1724_p3, %p39_p13  ;;  %p41_p9 = por %p40_p10, %p39_p13 }
  0x45   : > { %s189_s20 = sand.u32 1, %s1391_s17   ;;  %s1032_s28 = sshll.u32 %s1395_s18, 7 }
  0x46   : > { %s1725_s13 = scalar_select %p1549_p5, 1, 0 }
  0x47   : > { %s939_s24 = sshll.u32 %s189_s20, 3  ;;  %s1562_s27 = scalar_lea.hbm %s1712_s0, %s1032_s28 }
  0x48   : > { %s193_s29 = scalar_lea.vmem [#allocation2], %s939_s24  ;;  %p1566_p11 = pnand %p1069_p7, %p41_p9 }
  0x49   : > { %s201_s30 = sshll.u32 %s193_s29, 4  ;;  %s190_s6 = scalar_lea.sflag [#allocation3], %s189_s20  ;;  %s1564_s30 = int_to_ptr.vmem [resolvable:$true] %s201_s30 }
  0x4a   : > { %s1263_s25 = scalar_lea.hbm %s1562_s27, 128  ;;  %p1265_p0 = pneg %p1566_p11 }
  0x4b   : > { %p1264_p12 = scmp.ne.s32.totalorder %s1562_s27, %s1263_s25  ;;  %s1268_s26 = scalar_lea.hbm %s1712_s0, 256 }
  0x4c   : > { %p1269_p13 = scmp.lt.u32.totalorder %s1562_s27, %s1712_s0  ;;  %p1270_p6 = scmp.lt.u32.totalorder %s1268_s26, %s1263_s25 }
  0x4d   : > { %p1266_p2 = pnand %p1265_p0, %p1264_p12  ;;  %p1272_p3 = scmp.lt.u32.totalorder %s1263_s25, %s1562_s27 }
  0x4e   : > { %p1271_p10 = por %p1270_p6, %p1269_p13 }
  0x4f   : > { %p1267_p1 = pneg %p1266_p2 }
  0x50   : > { %p1273_p7 = por %p1272_p3, %p1271_p10 }
  0x52   : > { %p1274_p9 = pnand %p1273_p7, %p1267_p1 }
  0x54   : > { %1277 = shalt.err (!%p1274_p9)
}
  0x55   : > { %s1278_s20 = scalar_lea.vmem %s1564_s30, 128  ;;  %s1401_s28 = smov [#allocation2]  }
  0x56   : > { %p1279_p12 = scmp.ne.s32.totalorder %s1564_s30, %s1278_s20  ;;  %s1283_s11 = sshll.u32 %s1401_s28, 4  ;;  %s1284_s11 = int_to_ptr.vmem [resolvable:$false] %s1283_s11 }
  0x57   : > { %s1285_s12 = scalar_lea.vmem %s1284_s11, 256  ;;  %p1286_p4 = scmp.lt.s32.totalorder %s1564_s30, %s1284_s11 }
  0x58   : > { %p1281_p2 = pnand %p1279_p12, %p1265_p0  ;;  %p1287_p13 = scmp.lt.s32.totalorder %s1285_s12, %s1278_s20 }
  0x5a   : > { %p1282_p5 = pneg %p1281_p2  ;;  %p1288_p6 = por %p1287_p13, %p1286_p4 }
  0x5c   : > { %p1289_p10 = pnand %p1288_p6, %p1282_p5 }
  0x5e   : > { %1292 = shalt.err (!%p1289_p10)
}
  0x5f   : > { %1059 = dma.hbm_to_vmem [thread:$0]  (!%p1566_p11), %s1562_s27, 128, %s1564_s30, %s190_s6  }
  0x60   : > { %210 = sbr.rel (%p1469_p8) target bundleno = 1196 (0x4ac), region = 32  ;;  %s1598_s29 = sand.u32 (!%p1469_p8), 1, %s1387_s16  }
  0x61   : > { %s943_s25 = sshll.u32 (!%p1469_p8), %s1598_s29, 3  ;;  %s213_s7 = scalar_lea.sflag (!%p1469_p8), [#allocation3], %s1598_s29 }
  0x62   : > { %s216_s8 = scalar_lea.vmem (!%p1469_p8), [#allocation2], %s943_s25  ;;  %p1727_p4 = scmp.ne.s32.totalorder (!%p1469_p8), %s1720_s21, 0 }
  0x67   : > { %1366 = dma.done.wait (%p1727_p4), %s213_s7, 128  }
  0x68   : > { %1368 = vsyncadd (%p1727_p4), %s213_s7, 4294967168  ;;  %p1728_p5 = scmp.eq.s32.totalorder %s1450_s19, 0 }
  0x6a   : > { %1370 = dma.done.wait (%p1728_p5), [#allocation6], 8192   ;;  %p1729_p11 = pmov %p1728_p5 }
  0x6b   : > { %v1109_v0 = vld [vmem:[#allocation5 + $0x4] ss:$8 sps:$4 sm:$0xff]   ;;  %v1111_v1 = vld [vmem:[#allocation5] ss:$8 sps:$4 sm:$0xff]   ;;  %v1112_v2 = vld [vmem:[#allocation5 + $0x14] ss:$8 sps:$4 sm:$0xff]   ;;  %v497_v35 = vlaneseq }
  0x6c   : > { %1372 = vsyncadd (%p1729_p11), [#allocation6], 4294959104  ;;  %454 = vmatprep.subr.bf16.mxu0 %v1109_v0  ;;  %v1114_v3 = vld [vmem:[#allocation5 + $0x10] ss:$8 sps:$4 sm:$0xff]   ;;  %v1115_v4 = vld [vmem:[#allocation5 + $0x24] ss:$8 sps:$4 sm:$0xff]  }
  0x6d   : > { %455 = vmatpush1.bf16.msra.mxu0 %v1111_v1  ;;  %v1117_v5 = vld [vmem:[#allocation5 + $0x20] ss:$8 sps:$4 sm:$0xff]   ;;  %v1118_v6 = vld [vmem:[#allocation5 + $0x34] ss:$8 sps:$4 sm:$0xff]   ;;  %v1120_v7 = vld [vmem:[#allocation5 + $0x30] ss:$8 sps:$4 sm:$0xff]  }
  0x6e   : > { %456 = vmatprep.subr.bf16.mxu0 %v1112_v2  ;;  %v1121_v8 = vld [vmem:[#allocation5 + $0x44] ss:$8 sps:$4 sm:$0xff]   ;;  %v1123_v9 = vld [vmem:[#allocation5 + $0x40] ss:$8 sps:$4 sm:$0xff]   ;;  %v1124_v10 = vld [vmem:[#allocation5 + $0x54] ss:$8 sps:$4 sm:$0xff]  }
  0x6f   : > { %v1126_v11 = vld [vmem:[#allocation5 + $0x50] ss:$8 sps:$4 sm:$0xff]   ;;  %v1127_v12 = vld [vmem:[#allocation5 + $0x64] ss:$8 sps:$4 sm:$0xff]   ;;  %v1129_v13 = vld [vmem:[#allocation5 + $0x60] ss:$8 sps:$4 sm:$0xff]  }
  0x70   : > { %v254_v14 = vld [vmem:[%s216_s8] sm:$0xff]  ;;  %v1133_v18 = vld [vmem:[#allocation5 + $0x84] ss:$8 sps:$4 sm:$0xff]   ;;  %v1135_v19 = vld [vmem:[#allocation5 + $0x80] ss:$8 sps:$4 sm:$0xff]   ;;  %v498_v36 = vand.u32 127, %v497_v35 }
  0x71   : > { %457 = vmatpush1.bf16.msra.mxu0 %v1114_v3  ;;  %v1130_v15 = vld [vmem:[#allocation5 + $0x74] ss:$8 sps:$4 sm:$0xff]   ;;  %v949_v16 = vcombine.high %v254_v14, %v254_v14  ;;  %v1132_v17 = vld [vmem:[#allocation5 + $0x70] ss:$8 sps:$4 sm:$0xff]   ;;  %v1139_v22 = vld [vmem:[#allocation5 + $0xa4] ss:$8 sps:$4 sm:$0xff]   ;;  %v948_v34 = vcombine.low %v254_v14, %v254_v14 }
  0x72   : > { %458 = vmatprep.subr.bf16.mxu0 %v1115_v4  ;;  %v1136_v20 = vld [vmem:[#allocation5 + $0x94] ss:$8 sps:$4 sm:$0xff]   ;;  %v1138_v21 = vld [vmem:[#allocation5 + $0x90] ss:$8 sps:$4 sm:$0xff]   ;;  %v1141_v23 = vld [vmem:[#allocation5 + $0xa0] ss:$8 sps:$4 sm:$0xff]  }
  0x73   : > { %486 = vmatprep.mubr.bf16.mxu0 %v949_v16  ;;  %v1142_v24 = vld [vmem:[#allocation5 + $0xb4] ss:$8 sps:$4 sm:$0xff]   ;;  %v1144_v25 = vld [vmem:[#allocation5 + $0xb0] ss:$8 sps:$4 sm:$0xff]   ;;  %v1145_v26 = vld [vmem:[#allocation5 + $0xc4] ss:$8 sps:$4 sm:$0xff]  }
  0x74   : > { %v1147_v27 = vld [vmem:[#allocation5 + $0xc0] ss:$8 sps:$4 sm:$0xff]   ;;  %v1148_v28 = vld [vmem:[#allocation5 + $0xd4] ss:$8 sps:$4 sm:$0xff]   ;;  %v1150_v29 = vld [vmem:[#allocation5 + $0xd0] ss:$8 sps:$4 sm:$0xff]  }
  0x75   : > { %459 = vmatpush1.bf16.msra.mxu0 %v1117_v5  ;;  %v1151_v30 = vld [vmem:[#allocation5 + $0xe4] ss:$8 sps:$4 sm:$0xff]   ;;  %v1153_v31 = vld [vmem:[#allocation5 + $0xe0] ss:$8 sps:$4 sm:$0xff]   ;;  %v1154_v32 = vld [vmem:[#allocation5 + $0xf4] ss:$8 sps:$4 sm:$0xff]  }
  0x76   : > { %460 = vmatprep.subr.bf16.mxu0 %v1118_v6  ;;  %v1156_v33 = vld [vmem:[#allocation5 + $0xf0] ss:$8 sps:$4 sm:$0xff]   ;;  %vm500_vm0 = vcmp.lt.s32.totalorder %v498_v36, 64  ;;  %v1159_v48 = vld [vmem:[#allocation7 + $0x4] ss:$8 sps:$4 sm:$0xff]   ;;  %s946_s21 = sshll.u32 %s1598_s29, 4 }
  0x77   : > { %v1161_v49 = vld [vmem:[#allocation7] ss:$8 sps:$4 sm:$0xff]   ;;  %v1162_v50 = vld [vmem:[#allocation7 + $0x14] ss:$8 sps:$4 sm:$0xff]   ;;  %736 = vmatprep.subr.bf16.mxu1 %v1159_v48  ;;  %v1164_v51 = vld [vmem:[#allocation7 + $0x10] ss:$8 sps:$4 sm:$0xff]  }
  0x78   : > { %737 = vmatpush1.bf16.msra.mxu1 %v1161_v49  ;;  %v1165_v52 = vld [vmem:[#allocation7 + $0x24] ss:$8 sps:$4 sm:$0xff]   ;;  %v1167_v53 = vld [vmem:[#allocation7 + $0x20] ss:$8 sps:$4 sm:$0xff]   ;;  %v1168_v54 = vld [vmem:[#allocation7 + $0x34] ss:$8 sps:$4 sm:$0xff]  }
  0x79   : > { %461 = vmatpush1.bf16.msra.mxu0 %v1120_v7  ;;  %738 = vmatprep.subr.bf16.mxu1 %v1162_v50  ;;  %v1170_v55 = vld [vmem:[#allocation7 + $0x30] ss:$8 sps:$4 sm:$0xff]   ;;  %v1171_v56 = vld [vmem:[#allocation7 + $0x44] ss:$8 sps:$4 sm:$0xff]   ;;  %v1173_v57 = vld [vmem:[#allocation7 + $0x40] ss:$8 sps:$4 sm:$0xff]  }
  0x7a   : > { %462 = vmatprep.subr.bf16.mxu0 %v1121_v8  ;;  %v1174_v58 = vld [vmem:[#allocation7 + $0x54] ss:$8 sps:$4 sm:$0xff]   ;;  %v1176_v59 = vld [vmem:[#allocation7 + $0x50] ss:$8 sps:$4 sm:$0xff]   ;;  %v1177_v60 = vld [vmem:[#allocation7 + $0x64] ss:$8 sps:$4 sm:$0xff]  }
  0x7b   : > { %v1179_v61 = vld [vmem:[#allocation7 + $0x60] ss:$8 sps:$4 sm:$0xff]   ;;  %v1180_v62 = vld [vmem:[#allocation7 + $0x74] ss:$8 sps:$4 sm:$0xff]   ;;  %v1182_v63 = vld [vmem:[#allocation7 + $0x70] ss:$8 sps:$4 sm:$0xff]  }
  0x7c   : > { %739 = vmatpush1.bf16.msra.mxu1 %v1164_v51  ;;  %v1183_v0 = vld [vmem:[#allocation7 + $0x84] ss:$8 sps:$4 sm:$0xff]   ;;  %v1185_v1 = vld [vmem:[#allocation7 + $0x80] ss:$8 sps:$4 sm:$0xff]   ;;  %v1186_v2 = vld [vmem:[#allocation7 + $0x94] ss:$8 sps:$4 sm:$0xff]  }
  0x7d   : > { %463 = vmatpush1.bf16.msra.mxu0 %v1123_v9  ;;  %740 = vmatprep.subr.bf16.mxu1 %v1165_v52  ;;  %v1188_v3 = vld [vmem:[#allocation7 + $0x90] ss:$8 sps:$4 sm:$0xff]   ;;  %v1189_v4 = vld [vmem:[#allocation7 + $0xa4] ss:$8 sps:$4 sm:$0xff]   ;;  %v1191_v5 = vld [vmem:[#allocation7 + $0xa0] ss:$8 sps:$4 sm:$0xff]  }
  0x7e   : > { %464 = vmatprep.subr.bf16.mxu0 %v1124_v10  ;;  %v1192_v6 = vld [vmem:[#allocation7 + $0xb4] ss:$8 sps:$4 sm:$0xff]   ;;  %v1194_v7 = vld [vmem:[#allocation7 + $0xb0] ss:$8 sps:$4 sm:$0xff]   ;;  %v1195_v8 = vld [vmem:[#allocation7 + $0xc4] ss:$8 sps:$4 sm:$0xff]  }
  0x7f   : > { %v1197_v9 = vld [vmem:[#allocation7 + $0xc0] ss:$8 sps:$4 sm:$0xff]   ;;  %v1198_v10 = vld [vmem:[#allocation7 + $0xd4] ss:$8 sps:$4 sm:$0xff]   ;;  %s253_s23 = scalar_lea.vmem [#allocation9], %s946_s21  ;;  %s1033_s30 = sshll.u32 %s1450_s19, 8 }
  0x80   : > { %741 = vmatpush1.bf16.msra.mxu1 %v1167_v53  ;;  %v1204_v14 = vld [vmem:[#allocation7 + $0xf4] ss:$8 sps:$4 sm:$0xff]   ;;  %s813_s27 = sshll.u32 %s253_s23, 4  ;;  %s1641_s26 = scalar_lea.hbm %s1716_s4, %s1033_s30  ;;  %s814_s27 = int_to_ptr.vmem [resolvable:$true] %s813_s27 }
  0x81   : > { %465 = vmatpush1.bf16.msra.mxu0 %v1126_v11  ;;  %742 = vmatprep.subr.bf16.mxu1 %v1168_v54  ;;  %v1200_v11 = vld [vmem:[#allocation7 + $0xd0] ss:$8 sps:$4 sm:$0xff]   ;;  %s785_s10 = scalar_lea.sflag [#allocation10], %s1598_s29  ;;  %s1293_s24 = scalar_lea.vmem %s814_s27, 256 }
  0x82   : > { %466 = vmatprep.subr.bf16.mxu0 %v1127_v12  ;;  %v1201_v12 = vld [vmem:[#allocation7 + $0xe4] ss:$8 sps:$4 sm:$0xff]   ;;  %p1294_p8 = scmp.ne.s32.totalorder %s814_s27, %s1293_s24  ;;  %p1730_p0 = scmp.ne.s32.totalorder %s1725_s13, 0 }
  0x83   : > { %s1402_s20 = smov [#allocation9]  }
  0x84   : > { %743 = vmatpush1.bf16.msra.mxu1 %v1170_v55  ;;  %p1295_p1 = pnand %p1294_p8, %p1730_p0  ;;  %s1297_s28 = sshll.u32 %s1402_s20, 4  ;;  %s1298_s28 = int_to_ptr.vmem [resolvable:$false] %s1297_s28 }
  0x85   : > { %467 = vmatpush1.bf16.msra.mxu0 %v1129_v13  ;;  %744 = vmatprep.subr.bf16.mxu1 %v1171_v56  ;;  %v1203_v13 = vld [vmem:[#allocation7 + $0xe0] ss:$8 sps:$4 sm:$0xff]   ;;  %s1299_s11 = scalar_lea.vmem %s1298_s28, 512  ;;  %p1300_p7 = scmp.lt.s32.totalorder %s814_s27, %s1298_s28 }
  0x86   : > { %468 = vmatprep.subr.bf16.mxu0 %v1130_v15  ;;  %p1296_p3 = pneg %p1295_p1  ;;  %p1301_p9 = scmp.lt.s32.totalorder %s1299_s11, %s1293_s24 }
  0x88   : > { %745 = vmatpush1.bf16.msra.mxu1 %v1173_v57  ;;  %p1302_p12 = por %p1301_p9, %p1300_p7 }
  0x89   : > { %469 = vmatpush1.bf16.msra.mxu0 %v1132_v17  ;;  %746 = vmatprep.subr.bf16.mxu1 %v1174_v58  ;;  %v1206_v17 = vld [vmem:[#allocation7 + $0xf0] ss:$8 sps:$4 sm:$0xff]  }
  0x8a   : > { %470 = vmatprep.subr.bf16.mxu0 %v1133_v18  ;;  %p1303_p2 = pnand %p1302_p12, %p1296_p3 }
  0x8c   : > { %747 = vmatpush1.bf16.msra.mxu1 %v1176_v59 }
  0x8d   : > { %471 = vmatpush1.bf16.msra.mxu0 %v1135_v19  ;;  %748 = vmatprep.subr.bf16.mxu1 %v1177_v60 }
  0x8e   : > { %472 = vmatprep.subr.bf16.mxu0 %v1136_v20 }
  0x90   : > { %749 = vmatpush1.bf16.msra.mxu1 %v1179_v61 }
  0x91   : > { %473 = vmatpush1.bf16.msra.mxu0 %v1138_v21  ;;  %750 = vmatprep.subr.bf16.mxu1 %v1180_v62 }
  0x92   : > { %474 = vmatprep.subr.bf16.mxu0 %v1139_v22 }
  0x94   : > { %751 = vmatpush1.bf16.msra.mxu1 %v1182_v63 }
  0x95   : > { %475 = vmatpush1.bf16.msra.mxu0 %v1141_v23  ;;  %752 = vmatprep.subr.bf16.mxu1 %v1183_v0 }
  0x96   : > { %476 = vmatprep.subr.bf16.mxu0 %v1142_v24 }
  0x98   : > { %753 = vmatpush1.bf16.msra.mxu1 %v1185_v1 }
  0x99   : > { %477 = vmatpush1.bf16.msra.mxu0 %v1144_v25  ;;  %754 = vmatprep.subr.bf16.mxu1 %v1186_v2 }
  0x9a   : > { %478 = vmatprep.subr.bf16.mxu0 %v1145_v26 }
  0x9c   : > { %755 = vmatpush1.bf16.msra.mxu1 %v1188_v3 }
  0x9d   : > { %479 = vmatpush1.bf16.msra.mxu0 %v1147_v27  ;;  %756 = vmatprep.subr.bf16.mxu1 %v1189_v4 }
  0x9e   : > { %480 = vmatprep.subr.bf16.mxu0 %v1148_v28 }
  0xa0   : > { %757 = vmatpush1.bf16.msra.mxu1 %v1191_v5 }
  0xa1   : > { %481 = vmatpush1.bf16.msra.mxu0 %v1150_v29  ;;  %758 = vmatprep.subr.bf16.mxu1 %v1192_v6 }
  0xa2   : > { %482 = vmatprep.subr.bf16.mxu0 %v1151_v30 }
  0xa4   : > { %759 = vmatpush1.bf16.msra.mxu1 %v1194_v7 }
  0xa5   : > { %483 = vmatpush1.bf16.msra.mxu0 %v1153_v31  ;;  %760 = vmatprep.subr.bf16.mxu1 %v1195_v8 }
  0xa6   : > { %484 = vmatprep.subr.bf16.mxu0 %v1154_v32 }
  0xa8   : > { %761 = vmatpush1.bf16.msra.mxu1 %v1197_v9 }
  0xa9   : > { %485 = vmatpush1.bf16.msra.mxu0 %v1156_v33  ;;  %762 = vmatprep.subr.bf16.mxu1 %v1198_v10 }
  0xac   : > { %487 = vmatmul.mubr.bf16.vlgmr.msra.gmra.mrb[0].mxu0 %v948_v34  ;;  %763 = vmatpush1.bf16.msra.mxu1 %v1200_v11 }
  0xad   : > { %764 = vmatprep.subr.bf16.mxu1 %v1201_v12 }
  0xb0   : > { %765 = vmatpush1.bf16.msra.mxu1 %v1203_v13 }
  0xb1   : > { %766 = vmatprep.subr.bf16.mxu1 %v1204_v14 }
  0xb4   : > { %767 = vmatpush1.bf16.msra.mxu1 %v1206_v17 }
 0x17f   : > { %v1610_v37 = vpop.f32.mrb[0].mxu0 }
 0x180   : > { %v495_v38 = vand.u32 2147483647, %v1610_v37  ;;  %v1613_v39 = vpop.f32.mrb[1].mxu0  ;;  %v1022_v22 = vpack.c.bf16 %v1610_v37, %v1610_v37 }
 0x181   : > { %v492_v40 = vpop.f32.mrb[2].mxu0  ;;  %v1019_v21 = vpack.c.bf16 %v1613_v39, %v1613_v39 }
 0x182   : > { %v1615_v41 = vsel %vm500_vm0, %v495_v38, -inf  ;;  %v493_v42 = vpop.f32.mrb[3].mxu0 }
 0x183   : > { %vm508_vm1 = vcmp.lt.f32.partialorder %v1615_v41, inf }
 0x184   : > { %v510_v43 = vsel %vm508_vm1, %v1615_v41, -inf }
 0x185   : > { %513 = vmax.xlane.f32.xlu0 %v510_v43 }
 0x212   : > { %v514_v44 = vpop.xlane.xlu0 %513 }
 0x213   : > { %vm515_vm2 = vcmp.lt.f32.partialorder %v1615_v41, %v514_v44 }
 0x214   : > { %v517_v45 = vsel %vm515_vm2, %v1615_v41, -inf }
 0x215   : > { %520 = vmax.xlane.f32.xlu0 %v517_v45 }
 0x2a2   : > { %v521_v46 = vpop.xlane.xlu0 %520 }
 0x2a3   : > { %vm522_vm3 = vcmp.lt.f32.partialorder %v1615_v41, %v521_v46 }
 0x2a4   : > { %v524_v47 = vsel %vm522_vm3, %v1615_v41, -inf }
 0x2a5   : > { %527 = vmax.xlane.f32.xlu1 %v524_v47 }
 0x332   : > { %v528_v15 = vpop.xlane.xlu1 %527 }
 0x333   : > { %vm529_vm4 = vcmp.lt.f32.partialorder %v1615_v41, %v528_v15 }
 0x334   : > { %v531_v16 = vsel %vm529_vm4, %v1615_v41, -inf }
 0x335   : > { %534 = vmax.xlane.f32.xlu1 %v531_v16 }
 0x3c2   : > { %v535_v18 = vpop.xlane.xlu1 %534 }
 0x3c3   : > { %vm536_vm5 = vcmp.ge.f32.partialorder %v1615_v41, %v535_v18  ;;  %vm985_vm6 = vcmp.le.f32.partialorder %v535_v18, -inf }
 0x3c4   : > { %v538_v19 = vsel %vm536_vm5, %v1610_v37, 0.0  ;;  %v539_v20 = vsel %vm985_vm6, %v1613_v39, 0.0  ;;  %vm1021_vm7 = vmpackc.low %vm536_vm5, %vm536_vm5 }
 0x3c5   : > { %540 = vst [vmem:[%s253_s23] sm:$0xff] %v538_v19  ;;  %541 = vst [vmem:[%s253_s23 + $0x8] sm:$0xff] %v539_v20 }
 0x3c6   : > { %vm1018_vm8 = vmpackc.low %vm985_vm6, %vm985_vm6 }
 0x3c7   : > { %1020 = vmatprep.mubr.msk.bf16.mxu1 %vm1018_vm8, %v1019_v21 }
 0x3c8   : > { %1023 = vmatmul.mubr.msk.bf16.vlgmr.msra.gmra.mrb[0].mxu1 %vm1021_vm7, %v1022_v22 }
 0x3c9   : > { %1306 = shalt.err (!%p1303_p2)
}
 0x3ca   : > { %s1307_s12 = scalar_lea.hbm %s1641_s26, 256  ;;  %s1311_s8 = scalar_lea.hbm %s1716_s4, 512 }
 0x3cb   : > { %p1308_p13 = scmp.ne.s32.totalorder %s1641_s26, %s1307_s12  ;;  %p1312_p4 = scmp.lt.u32.totalorder %s1641_s26, %s1716_s4 }
 0x3cc   : > { %p1313_p5 = scmp.lt.u32.totalorder %s1311_s8, %s1307_s12  ;;  %p1315_p8 = scmp.lt.u32.totalorder %s1307_s12, %s1641_s26 }
 0x3cd   : > { %p1309_p6 = pnand %p1308_p13, %p1730_p0 }
 0x3ce   : > { %p1314_p11 = por %p1313_p5, %p1312_p4 }
 0x3cf   : > { %p1310_p10 = pneg %p1309_p6 }
 0x3d0   : > { %p1316_p1 = por %p1315_p8, %p1314_p11 }
 0x3d2   : > { %p1317_p3 = pnand %p1316_p1, %p1310_p10 }
 0x3d4   : > { %1320 = shalt.err (!%p1317_p3)
}
 0x3d5   : > { %1046 = dma.vmem_to_hbm [thread:$0]  (%p1730_p0), %s814_s27, 256, %s1641_s26, %s785_s10  }
 0x3d6   : > { %s246_s6 = scalar_lea.vmem [#allocation8], %s946_s21  ;;  %s1670_s11 = scalar_lea.hbm %s1715_s3, %s1033_s30 }
 0x3d7   : > { %s799_s24 = sshll.u32 %s246_s6, 4  ;;  %s780_s27 = scalar_lea.sflag [#allocation4], %s1598_s29  ;;  %s1663_s24 = int_to_ptr.vmem [resolvable:$true] %s799_s24 }
 0x3d8   : > { %s1321_s21 = scalar_lea.vmem %s1663_s24, 256  ;;  %s1403_s26 = smov [#allocation8]  }
 0x3d9   : > { %p1322_p7 = scmp.ne.s32.totalorder %s1663_s24, %s1321_s21  ;;  %s1325_s10 = sshll.u32 %s1403_s26, 4  ;;  %s1326_s10 = int_to_ptr.vmem [resolvable:$false] %s1325_s10 }
 0x3da   : > { %s1327_s19 = scalar_lea.vmem %s1326_s10, 512  ;;  %p1328_p2 = scmp.lt.s32.totalorder %s1663_s24, %s1326_s10 }
 0x3db   : > { %p1323_p9 = pnand %p1322_p7, %p1730_p0  ;;  %p1329_p13 = scmp.lt.s32.totalorder %s1327_s19, %s1321_s21 }
 0x3dd   : > { %p1324_p12 = pneg %p1323_p9  ;;  %p1330_p6 = por %p1329_p13, %p1328_p2 }
 0x3df   : > { %p1331_p10 = pnand %p1330_p6, %p1324_p12 }
 0x49b   : > { %v770_v23 = vpop.f32.mrb[0].mxu1 }
 0x49c   : > { %777 = vst [vmem:[%s246_s6] sm:$0xff] %v770_v23  ;;  %v772_v24 = vpop.f32.mrb[1].mxu1 }
 0x49d   : > { %778 = vst [vmem:[%s246_s6 + $0x8] sm:$0xff] %v772_v24  ;;  %v774_v25 = vpop.f32.mrb[2].mxu1 }
 0x49e   : > { %v775_v26 = vpop.f32.mrb[3].mxu1 }
 0x49f   : > { %1334 = shalt.err (!%p1331_p10)
}
 0x4a0   : > { %s1335_s29 = scalar_lea.hbm %s1670_s11, 256  ;;  %s1339_s25 = scalar_lea.hbm %s1715_s3, 512 }
 0x4a1   : > { %p1336_p4 = scmp.ne.s32.totalorder %s1670_s11, %s1335_s29  ;;  %p1340_p8 = scmp.lt.u32.totalorder %s1670_s11, %s1715_s3 }
 0x4a2   : > { %p1341_p1 = scmp.lt.u32.totalorder %s1339_s25, %s1335_s29  ;;  %p1343_p7 = scmp.lt.u32.totalorder %s1335_s29, %s1670_s11 }
 0x4a3   : > { %p1337_p5 = pnand %p1336_p4, %p1730_p0 }
 0x4a4   : > { %p1342_p3 = por %p1341_p1, %p1340_p8 }
 0x4a5   : > { %p1338_p11 = pneg %p1337_p5 }
 0x4a6   : > { %p1344_p9 = por %p1343_p7, %p1342_p3 }
 0x4a8   : > { %p1345_p12 = pnand %p1344_p9, %p1338_p11 }
 0x4aa   : > { %1348 = shalt.err (!%p1345_p12)
}
 0x4ab   : > { %1045 = dma.vmem_to_hbm [thread:$0]  (%p1730_p0), %s1663_s24, 256, %s1670_s11, %s780_s27  }
 0x4ac PF: > { %s825_s23 = sand.u32 1, %s1383_s15   ;;  %p1731_p2 = scmp.ne.s32.totalorder %s1721_s22, 0 }
 0x4ad   : > { %p1732_p13 = scmp.ge.s32.totalorder %s1395_s18, 2  ;;  %s826_s5 = scalar_lea.sflag [#allocation4], %s825_s23 }
 0x4af   : > { %p1061_p6 = pnand %p1732_p13, %p1731_p2 }
 0x4b1   : > { %1374 = dma.done.wait (!%p1061_p6), %s826_s5, 256  }
 0x4b2   : > { %1376 = vsyncadd (!%p1061_p6), %s826_s5, 4294967040  ;;  %s835_s6 = scalar_lea.sflag [#allocation10], %s825_s23 }
 0x4b3   : > { %1378 = dma.done.wait (!%p1061_p6), %s835_s6, 256  }
 0x4b4   : > { %1380 = vsyncadd (!%p1061_p6), %s835_s6, 4294967040  ;;  %p22_p0 = scmp.ge.s32.totalorder %s1539_s9, 4   ;;  %s1733_s15 = smov %s1387_s16 }
 0x4b5   : > { %s1734_s16 = smov %s1391_s17  ;;  %s1735_s17 = smov %s1555_s14 }
 0x4b6   : > { %s1736_s18 = smov %s1539_s9  ;;  %24 = sbr.rel (!%p22_p0) target bundleno = 8 (0x8), region = 102 }
 0x4bd   :  { %840 = vsyncpa [#allocation3], 1 }
 0x4be   :  { %842 = vsyncpa [#allocation3 + $0x1], 1 }
 0x4bf   :  { %843 = vsyncpa [#allocation6], 1 }
 0x4c0   :  { %844 = vsyncpa [#allocation4], 1 }
 0x4c1   :  { %846 = vsyncpa [#allocation4 + $0x1], 1 }
 0x4c2   :  { %847 = vsyncpa [#allocation10], 1 }
 0x4c3   :  { %849 = vsyncpa [#allocation10 + $0x1], 1 }

</bundles_post_ra>
